<compile_context>
chip_gen: v7x
topology: tpu7x:2x2x1
jax: 0.10.0
libtpu: 0.0.40
codegen_flags: <defaults>
</compile_context>

<pallas_src>
import jax
import jax.numpy as jnp
from jax.experimental import pallas as pl
from jax.experimental.pallas import tpu as pltpu

DIM = 3
HIDDEN = 128
# TODO(synk): the custom Conv1d wrapper in network2.py is not shown; 'lrelu' is assumed to be
# LeakyReLU(negative_slope=0.2) (common in point-cloud code). Verify the slope before trusting numerics.
LRELU_SLOPE = 0.2


def _lrelu(x):
    # identical to where(x>0, x, slope*x) for 0 < slope < 1, but cheaper on the VPU
    return jnp.maximum(x, LRELU_SLOPE * x)


def _mlp_kernel(x_ref, w1_ref, b1_ref, w2_ref, b2_ref, w3_ref, b3_ref, o_ref):
    # x_ref: (1, DIM, TILE_N) f32
    # w1: (H, DIM) f32 (VPU layer)   w2: (H, H) bf16   w3: (DIM, H) bf16
    # b1: (H, 1) f32                 b2: (H, 1) f32    b3: (DIM, 1) f32
    x = x_ref[0]                                   # (DIM, TILE_N) f32, kept for the residual
    w1 = w1_ref[...]                               # (H, DIM) f32

    # ---- layer 1 on the VPU: K=3 would waste a full MXU pass at <5% array utilization ----
    # h[:, n] = sum_d w1[:, d] * x[d, n]  -> 3 broadcast FMAs, f32 accumulation.
    h = w1[:, 0:1] * x[0:1, :]                     # (H,1) lane-bcast * (1,TILE_N) sublane-bcast
    for d in range(1, DIM):
        h = h + w1[:, d:d + 1] * x[d:d + 1, :]
    h = _lrelu(h + b1_ref[...])                    # (H, TILE_N) f32

    # ---- layer 2 on the MXU: 128x128, bf16 operands, f32 accumulation ----
    h = jnp.dot(w2_ref[...], h.astype(jnp.bfloat16),
                preferred_element_type=jnp.float32)
    h = _lrelu(h + b2_ref[...])                    # (H, TILE_N) f32

    # ---- layer 3 on the MXU (M=3). TODO(synk): optional VPU/XLU sublane-reduction if the
    # bundle dump shows MXU (not VALU) still binding after the layer-1 move. ----
    y = jnp.dot(w3_ref[...], h.astype(jnp.bfloat16),
                preferred_element_type=jnp.float32)                       # (DIM, TILE_N)

    o_ref[0] = (y + b3_ref[...] + x).astype(o_ref.dtype)                  # bias + residual in f32


def deformation_shared_mlp(x_ncw, params, *, tile_n=4096, num_cores=2):
    """x_ncw: (B, DIM, N) float32 in PyTorch NCW layout. Returns the same layout/dtype."""
    w1, b1, w2, b2, w3, b3 = params
    B, C, N = x_ncw.shape
    assert C == DIM
    assert tile_n % 128 == 0 and tile_n >= 128

    # Clamp the tile to (lane-rounded) N.
    tile_n = min(tile_n, pl.cdiv(N, 128) * 128)
    # Guarantee >= 2*num_cores grid steps (v7x has 2 TensorCores; also enables DMA/compute overlap).
    while B * pl.cdiv(N, tile_n) < 2 * num_cores and tile_n > 512:
        tile_n = pl.cdiv(tile_n // 2, 128) * 128   # halve, keep a multiple of 128
    grid_n = pl.cdiv(N, tile_n)                    # ragged N: partial last block, masked writes

    # Layer 1 runs on the VPU -> keep w1 in f32; layers 2/3 use bf16 MXU operands, f32 accum.
    w2b = w2.astype(jnp.bfloat16)
    w3b = w3.astype(jnp.bfloat16)

    full = lambda arr: pl.BlockSpec(arr.shape, lambda b, n: (0,) * arr.ndim)

    cost = pl.CostEstimate(
        flops=2 * B * N * (DIM * HIDDEN + HIDDEN * HIDDEN + HIDDEN * DIM),
        transcendentals=0,
        bytes_accessed=int(2 * B * DIM * N * 4
                           + w1.size * 4 + b1.size * 4
                           + w2b.size * 2 + b2.size * 4
                           + w3b.size * 2 + b3.size * 4),
    )

    return pl.pallas_call(
        _mlp_kernel,
        out_shape=jax.ShapeDtypeStruct((B, DIM, N), x_ncw.dtype),
        grid_spec=pltpu.PrefetchScalarGridSpec(
            num_scalar_prefetch=0,
            grid=(B, grid_n),
            in_specs=[
                pl.BlockSpec((1, DIM, tile_n), lambda b, n: (b, 0, n)),
                full(w1), full(b1), full(w2b), full(b2), full(w3b), full(b3),
            ],
            out_specs=pl.BlockSpec((1, DIM, tile_n), lambda b, n: (b, 0, n)),
        ),
        compiler_params=pltpu.CompilerParams(
            dimension_semantics=("parallel", "parallel")),
        cost_estimate=cost,
    )(x_ncw, w1, b1, w2b, b2, w3b, b3)


def init_params(key):
    """Deterministic init mimicking nn.Conv1d: weight (out, in) [k=1 squeezed], bias (out, 1)."""
    k1, k2, k3, k4, k5, k6 = jax.random.split(key, 6)

    def uinit(k, shape, fan_in):
        bound = 1.0 / jnp.sqrt(fan_in)
        return jax.random.uniform(k, shape, jnp.float32, -bound, bound)

    w1 = uinit(k1, (HIDDEN, DIM), DIM)
    b1 = uinit(k2, (HIDDEN, 1), DIM)
    w2 = uinit(k3, (HIDDEN, HIDDEN), HIDDEN)
    b2 = uinit(k4, (HIDDEN, 1), HIDDEN)
    w3 = uinit(k5, (DIM, HIDDEN), HIDDEN)
    b3 = uinit(k6, (DIM, 1), HIDDEN)
    return (w1, b1, w2, b2, w3, b3)


def reference(x_ncw, params):
    """Pure-JAX reference matching the kernel math: f32 layer 1, bf16-operand/f32-accum layers 2-3."""
    w1, b1, w2, b2, w3, b3 = params
    bf = lambda a: a.astype(jnp.bfloat16)

    h = jnp.einsum('hd,bdn->bhn', w1, x_ncw)                # f32 (layer 1 is on the VPU in-kernel)
    h = _lrelu(h + b1[None])
    h = jnp.einsum('kh,bhn->bkn', bf(w2), bf(h), preferred_element_type=jnp.float32)
    h = _lrelu(h + b2[None])
    y = jnp.einsum('dh,bhn->bdn', bf(w3), bf(h), preferred_element_type=jnp.float32)
    y = y + b3[None]
    return y + x_ncw


if __name__ == "__main__":
    key = jax.random.PRNGKey(0)
    kp, kx = jax.random.split(key)

    params = init_params(kp)

    # Small example: 2 patches, 1000 points each.
    # Ragged N -> exercises the masked partial last block and the >=2-steps-per-core grid logic
    # (tile_n shrinks 4096 -> 1024 -> 512, giving a (2, 2) grid with a 488-wide tail block).
    B, N = 2, 1000
    x = jax.random.normal(kx, (B, DIM, N), jnp.float32)

    out = deformation_shared_mlp(x, params)
    out = jax.block_until_ready(out)

    ref = reference(x, params)
    assert out.shape == (B, DIM, N)
    max_err = float(jnp.max(jnp.abs(out - ref)))
    assert jnp.allclose(out, ref, atol=1e-2, rtol=1e-2), max_err

    print("KERNEL_OK")
</pallas_src>

<mosaic_0001>
module attributes {stable_mosaic.version = 11 : i64} {
  func.func @_mlp_kernel(%arg0: i32, %arg1: i32, %arg2: memref<1x3x512xf32, #tpu.memory_space<vmem>>, %arg3: memref<128x3xf32, #tpu.memory_space<vmem>>, %arg4: memref<128x1xf32, #tpu.memory_space<vmem>>, %arg5: memref<128x128xbf16, #tpu.memory_space<vmem>>, %arg6: memref<128x1xf32, #tpu.memory_space<vmem>>, %arg7: memref<3x128xbf16, #tpu.memory_space<vmem>>, %arg8: memref<3x1xf32, #tpu.memory_space<vmem>>, %arg9: memref<1x3x512xf32, #tpu.memory_space<vmem>>) attributes {dimension_semantics = [#tpu.dimension_semantics<parallel>, #tpu.dimension_semantics<parallel>], iteration_bounds = array<i64: 2, 2>, scalar_prefetch = 0 : i64, scratch_operands = 0 : i64, tpu.core_type = #tpu.core_type<tc>, window_params = [{transform_indices = @transform_0, window_bounds = array<i64: 1, 3, 512>}, {pipeline_mode = #tpu.pipeline_mode<synchronous>, transform_indices = @transform_1, window_bounds = array<i64: 128, 3>}, {pipeline_mode = #tpu.pipeline_mode<synchronous>, transform_indices = @transform_2, window_bounds = array<i64: 128, 1>}, {pipeline_mode = #tpu.pipeline_mode<synchronous>, transform_indices = @transform_3, window_bounds = array<i64: 128, 128>}, {pipeline_mode = #tpu.pipeline_mode<synchronous>, transform_indices = @transform_4, window_bounds = array<i64: 128, 1>}, {pipeline_mode = #tpu.pipeline_mode<synchronous>, transform_indices = @transform_5, window_bounds = array<i64: 3, 128>}, {pipeline_mode = #tpu.pipeline_mode<synchronous>, transform_indices = @transform_6, window_bounds = array<i64: 3, 1>}, {transform_indices = @transform_7, window_bounds = array<i64: 1, 3, 512>}]} {
    %c0 = arith.constant 0 : index
    %c0_0 = arith.constant 0 : index
    %c0_1 = arith.constant 0 : index
    %0 = vector.load %arg2[%c0, %c0_0, %c0_1] : memref<1x3x512xf32, #tpu.memory_space<vmem>>, vector<1x3x512xf32>
    %1 = vector.shape_cast %0 : vector<1x3x512xf32> to vector<3x512xf32>
    %c0_2 = arith.constant 0 : index
    %c0_3 = arith.constant 0 : index
    %2 = vector.load %arg3[%c0_2, %c0_3] : memref<128x3xf32, #tpu.memory_space<vmem>>, vector<128x3xf32>
    %3 = vector.extract_strided_slice %2 {offsets = [0, 0], sizes = [128, 1], strides = [1, 1]} : vector<128x3xf32> to vector<128x1xf32>
    %4 = vector.extract_strided_slice %1 {offsets = [0, 0], sizes = [1, 512], strides = [1, 1]} : vector<3x512xf32> to vector<1x512xf32>
    %5 = vector.broadcast %3 : vector<128x1xf32> to vector<128x512xf32>
    %6 = vector.broadcast %4 : vector<1x512xf32> to vector<128x512xf32>
    %7 = arith.mulf %5, %6 : vector<128x512xf32>
    %8 = vector.extract_strided_slice %2 {offsets = [0, 1], sizes = [128, 1], strides = [1, 1]} : vector<128x3xf32> to vector<128x1xf32>
    %9 = vector.extract_strided_slice %1 {offsets = [1, 0], sizes = [1, 512], strides = [1, 1]} : vector<3x512xf32> to vector<1x512xf32>
    %10 = vector.broadcast %8 : vector<128x1xf32> to vector<128x512xf32>
    %11 = vector.broadcast %9 : vector<1x512xf32> to vector<128x512xf32>
    %12 = arith.mulf %10, %11 : vector<128x512xf32>
    %13 = arith.addf %7, %12 : vector<128x512xf32>
    %14 = vector.extract_strided_slice %2 {offsets = [0, 2], sizes = [128, 1], strides = [1, 1]} : vector<128x3xf32> to vector<128x1xf32>
    %15 = vector.extract_strided_slice %1 {offsets = [2, 0], sizes = [1, 512], strides = [1, 1]} : vector<3x512xf32> to vector<1x512xf32>
    %16 = vector.broadcast %14 : vector<128x1xf32> to vector<128x512xf32>
    %17 = vector.broadcast %15 : vector<1x512xf32> to vector<128x512xf32>
    %18 = arith.mulf %16, %17 : vector<128x512xf32>
    %19 = arith.addf %13, %18 : vector<128x512xf32>
    %c0_4 = arith.constant 0 : index
    %c0_5 = arith.constant 0 : index
    %20 = vector.load %arg4[%c0_4, %c0_5] : memref<128x1xf32, #tpu.memory_space<vmem>>, vector<128x1xf32>
    %21 = vector.broadcast %20 : vector<128x1xf32> to vector<128x512xf32>
    %22 = arith.addf %19, %21 : vector<128x512xf32>
    %cst = arith.constant 2.000000e-01 : f32
    %23 = vector.broadcast %cst : f32 to vector<128x512xf32>
    %24 = arith.mulf %23, %22 : vector<128x512xf32>
    %25 = arith.maximumf %22, %24 : vector<128x512xf32>
    %c0_6 = arith.constant 0 : index
    %c0_7 = arith.constant 0 : index
    %26 = vector.load %arg5[%c0_6, %c0_7] : memref<128x128xbf16, #tpu.memory_space<vmem>>, vector<128x128xbf16>
    %27 = arith.truncf %25 : vector<128x512xf32> to vector<128x512xbf16>
    %cst_8 = arith.constant dense<0.000000e+00> : vector<128x512xf32>
    %28 = tpu.matmul %26, %27, %cst_8 {dimension_numbers = #tpu.dot_dimension_numbers<[1], [0], [0], [1], [0, 0, 1, 1], [], []>} : vector<128x128xbf16>, vector<128x512xbf16>, vector<128x512xf32> -> vector<128x512xf32>
    %c0_9 = arith.constant 0 : index
    %c0_10 = arith.constant 0 : index
    %29 = vector.load %arg6[%c0_9, %c0_10] : memref<128x1xf32, #tpu.memory_space<vmem>>, vector<128x1xf32>
    %30 = vector.broadcast %29 : vector<128x1xf32> to vector<128x512xf32>
    %31 = arith.addf %28, %30 : vector<128x512xf32>
    %cst_11 = arith.constant 2.000000e-01 : f32
    %32 = vector.broadcast %cst_11 : f32 to vector<128x512xf32>
    %33 = arith.mulf %32, %31 : vector<128x512xf32>
    %34 = arith.maximumf %31, %33 : vector<128x512xf32>
    %c0_12 = arith.constant 0 : index
    %c0_13 = arith.constant 0 : index
    %35 = vector.load %arg7[%c0_12, %c0_13] : memref<3x128xbf16, #tpu.memory_space<vmem>>, vector<3x128xbf16>
    %36 = arith.truncf %34 : vector<128x512xf32> to vector<128x512xbf16>
    %cst_14 = arith.constant dense<0.000000e+00> : vector<3x512xf32>
    %37 = tpu.matmul %35, %36, %cst_14 {dimension_numbers = #tpu.dot_dimension_numbers<[1], [0], [0], [1], [0, 0, 1, 1], [], []>} : vector<3x128xbf16>, vector<128x512xbf16>, vector<3x512xf32> -> vector<3x512xf32>
    %c0_15 = arith.constant 0 : index
    %c0_16 = arith.constant 0 : index
    %38 = vector.load %arg8[%c0_15, %c0_16] : memref<3x1xf32, #tpu.memory_space<vmem>>, vector<3x1xf32>
    %39 = vector.broadcast %38 : vector<3x1xf32> to vector<3x512xf32>
    %40 = arith.addf %37, %39 : vector<3x512xf32>
    %41 = arith.addf %40, %1 : vector<3x512xf32>
    %c0_17 = arith.constant 0 : index
    %c0_18 = arith.constant 0 : index
    %c0_19 = arith.constant 0 : index
    %42 = vector.load %arg9[%c0_17, %c0_18, %c0_19] : memref<1x3x512xf32, #tpu.memory_space<vmem>>, vector<1x3x512xf32>
    %43 = vector.shape_cast %42 : vector<1x3x512xf32> to vector<3x512xf32>
    %44 = vector.shape_cast %41 : vector<3x512xf32> to vector<1x3x512xf32>
    tpu.vector_store %arg9[%c0_17, %c0_18, %c0_19], %44 {strides = array<i32>} : memref<1x3x512xf32, #tpu.memory_space<vmem>>, vector<1x3x512xf32>,
    return
  }
  func.func @transform_0(%arg0: i32, %arg1: i32) -> (i32, i32, i32) {
    %c0_i32 = arith.constant 0 : i32
    %c0_i32_0 = arith.constant 0 : i32
    return %arg0, %c0_i32, %arg1 : i32, i32, i32
  }
  func.func @transform_1(%arg0: i32, %arg1: i32) -> (i32, i32) {
    %c0_i32 = arith.constant 0 : i32
    %c0_i32_0 = arith.constant 0 : i32
    %c0_i32_1 = arith.constant 0 : i32
    return %c0_i32, %c0_i32_0 : i32, i32
  }
  func.func @transform_2(%arg0: i32, %arg1: i32) -> (i32, i32) {
    %c0_i32 = arith.constant 0 : i32
    %c0_i32_0 = arith.constant 0 : i32
    %c0_i32_1 = arith.constant 0 : i32
    return %c0_i32, %c0_i32_0 : i32, i32
  }
  func.func @transform_3(%arg0: i32, %arg1: i32) -> (i32, i32) {
    %c0_i32 = arith.constant 0 : i32
    %c0_i32_0 = arith.constant 0 : i32
    %c0_i32_1 = arith.constant 0 : i32
    return %c0_i32, %c0_i32_0 : i32, i32
  }
  func.func @transform_4(%arg0: i32, %arg1: i32) -> (i32, i32) {
    %c0_i32 = arith.constant 0 : i32
    %c0_i32_0 = arith.constant 0 : i32
    %c0_i32_1 = arith.constant 0 : i32
    return %c0_i32, %c0_i32_0 : i32, i32
  }
  func.func @transform_5(%arg0: i32, %arg1: i32) -> (i32, i32) {
    %c0_i32 = arith.constant 0 : i32
    %c0_i32_0 = arith.constant 0 : i32
    %c0_i32_1 = arith.constant 0 : i32
    return %c0_i32, %c0_i32_0 : i32, i32
  }
  func.func @transform_6(%arg0: i32, %arg1: i32) -> (i32, i32) {
    %c0_i32 = arith.constant 0 : i32
    %c0_i32_0 = arith.constant 0 : i32
    %c0_i32_1 = arith.constant 0 : i32
    return %c0_i32, %c0_i32_0 : i32, i32
  }
  func.func @transform_7(%arg0: i32, %arg1: i32) -> (i32, i32, i32) {
    %c0_i32 = arith.constant 0 : i32
    %c0_i32_0 = arith.constant 0 : i32
    return %arg0, %c0_i32, %arg1 : i32, i32, i32
  }
}

</mosaic_0001>

<bundles_post_ra>
// kernel: tpu_custom_call.1
= control target key start
LH: loop header
LB: loop body
LE: loop exit
PB: predicated region body
PF: predicated region fallthrough
CT: control target
= control target key end

     0   :  { %s2224_s24 = smov 0   ;;  %s2226_s25 = smov 0   ;;  %s3136_s0 = inlined_call_operand.vmem [shape: f32[2,3,1000], index: 0, kind: input, shape index: {}]   ;;  %s3137_s1 = inlined_call_operand.vmem [shape: f32[128,3], index: 1, kind: input, shape index: {}]   ;;  %s3138_s2 = inlined_call_operand.vmem [shape: f32[128,1], index: 2, kind: input, shape index: {}]   ;;  %s3139_s3 = inlined_call_operand.vmem [shape: bf16[128,128], index: 3, kind: input, shape index: {}]   ;;  %s3140_s4 = inlined_call_operand.vmem [shape: f32[128,1], index: 4, kind: input, shape index: {}]   ;;  %s3141_s5 = inlined_call_operand.vmem [shape: bf16[3,128], index: 5, kind: input, shape index: {}]   ;;  %s3142_s6 = inlined_call_operand.vmem [shape: f32[3,1], index: 6, kind: input, shape index: {}]   ;;  %s3143_s7 = inlined_call_operand.vmem [shape: f32[2,3,1000], index: 7, kind: output, shape index: {}]  }
   0x1   :  { %s2228_s26 = smov 0   ;;  %s2230_s27 = smov 0  }
   0x2   :  { %s2232_s28 = smov 0  }
   0x3 LB: > { %s26_s29 = sadd.s32 1, %s2171_s26  ;;  %s29_s30 = sadd.s32 1, %s2175_s27  ;;  %s2179_s28 = sphi %s2232_s28, %s17_s28   ;;  %s2175_s27 = sphi %s2230_s27, %s3181_s27   ;;  %s2171_s26 = sphi %s2228_s26, %s3180_s26   ;;  %s2167_s25 = sphi %s2226_s25, %s3179_s25   ;;  %s2163_s24 = sphi %s2224_s24, %s3178_s24  }
   0x4   : > { %p27_p0 = scmp.ge.s32.totalorder %s26_s29, 2  ;;  %p2042_p1 = scmp.ge.s32.totalorder %s2179_s28, 1 }
   0x5   : > { %p258_p2 = scmp.lt.s32.totalorder %s2179_s28, 5 }
   0x6   : > { %s3183_s29 = smov (%p27_p0, %s26_s29), 0  ;;  %s3185_s30 = smov (!%p27_p0, %s29_s30), %s2175_s27 }
   0x7   : > { %p259_p3 = pnand %p2042_p1, %p258_p2  ;;  %p31_p4 = scmp.ge.s32.totalorder %s3185_s30, 2 }
   0x9   : > { %s3187_s30 = smov (%p31_p4, %s3185_s30), 0  ;;  %262 = sbr.rel (%p259_p3) target bundleno = 841 (0x349), region = 48 }
  0x10   : > { %v321_v0 = vld [vmem:[%s3137_s1] sm:$0xff]  ;;  %v2181_v1 = vmov 2   ;;  %v2182_v2 = vmov 1   ;;  %v323_v3 = vld [vmem:[%s3137_s1 + $0x10] sm:$0xff]  ;;  %v322_v4 = vld [vmem:[%s3137_s1 + $0x8] sm:$0xff]  ;;  %v3149_v5 = vmov 0   ;;  %v419_v48 = vlaneseq }
  0x11   : > { %2103 = vset.pattern.permute.xlu0 %v2181_v1  ;;  %2102 = vset.pattern.permute.xlu1 %v2182_v2  ;;  %v326_v6 = vld [vmem:[%s3137_s1 + $0x28] sm:$0xff]  ;;  %v325_v7 = vld [vmem:[%s3137_s1 + $0x20] sm:$0xff]  ;;  %v328_v8 = vld [vmem:[%s3137_s1 + $0x38] sm:$0xff]  ;;  %s2043_s16 = sshll.u32 %s2163_s24, 2  ;;  %p299_p5 = scmp.lt.s32.totalorder %s2167_s25, 1 }
  0x12   : > { %748 = vperm.xlu0 %2103, %v321_v0   ;;  %520 = vperm.xlu1 %2102, %v321_v0   ;;  %v2287_v9 = vld [vmem:[%s3137_s1 + $0x48] sm:$0xff]  ;;  %v324_v10 = vld [vmem:[%s3137_s1 + $0x18] sm:$0xff]  ;;  %v975_v14 = vld [vmem:[%s3138_s2] sm:$0xff]  ;;  %p301_p6 = scmp.lt.s32.totalorder %s2043_s16, 7  ;;  %v420_v51 = vshrl.u32 %v419_v48, 7 }
  0x13   : > { %1487 = vmatprep.mubr.bf16.mxu0 %v3149_v5  ;;  %1600 = vmatprep.mubr.bf16.mxu1 %v3149_v5  ;;  %v2296_v11 = vld [vmem:[%s3137_s1 + $0x58] sm:$0xff]  ;;  %v2302_v12 = vld [vmem:[%s3137_s1 + $0x68] sm:$0xff]  ;;  %v327_v16 = vld [vmem:[%s3137_s1 + $0x30] sm:$0xff]  ;;  %s3189_s25 = smov (!%p299_p5, %s2167_s25), 1 }
  0x14   : > { %v2309_v13 = vld [vmem:[%s3137_s1 + $0x78] sm:$0xff]  ;;  %v976_v15 = vld [vmem:[%s3138_s2 + $0x8] sm:$0xff]  ;;  %v977_v17 = vld [vmem:[%s3138_s2 + $0x10] sm:$0xff]  ;;  %s3191_s16 = smov (!%p301_p6, %s2043_s16), 7  ;;  %s2044_s17 = sshll.u32 %s3189_s25, 3  ;;  %v585_v55 = vsub.s32 1, %v420_v51 }
  0x15   : > { %v979_v18 = vld [vmem:[%s3138_s2 + $0x20] sm:$0xff]  ;;  %v978_v19 = vld [vmem:[%s3138_s2 + $0x18] sm:$0xff]  ;;  %v981_v20 = vld [vmem:[%s3138_s2 + $0x30] sm:$0xff]  ;;  %s2430_s24 = sadd.s32 %s2044_s17, %s3191_s16  ;;  %v589_v56 = vsub.s32 5, %v420_v51  ;;  %v813_v60 = vsub.s32 2, %v420_v51  ;;  %v817_v61 = vsub.s32 6, %v420_v51 }
  0x16   : > { %756 = vperm.xlu0 %2103, %v323_v3   ;;  %524 = vperm.xlu1 %2102, %v322_v4   ;;  %v983_v21 = vld [vmem:[%s3138_s2 + $0x40] sm:$0xff]  ;;  %v985_v22 = vld [vmem:[%s3138_s2 + $0x50] sm:$0xff]  ;;  %v980_v23 = vld [vmem:[%s3138_s2 + $0x28] sm:$0xff]  ;;  %s2045_s18 = sshll.u32 %s2430_s24, 2  ;;  %v425_v63 = vsub.s32 4, %v420_v51 }
  0x17   : > { %v329_v24 = vld [vmem:[%s3137_s1 + $0x40] sm:$0xff]  ;;  %v990_v26 = vld [vmem:[%s3138_s2 + $0x78] sm:$0xff]  ;;  %v1312_v27 = vld [vmem:[%s3140_s4 + $0x8] sm:$0xff]  ;;  %s2448_s22 = scalar_lea.vmem %s3136_s0, %s2045_s18 }
  0x18   : > { %v987_v25 = vld [vmem:[%s3138_s2 + $0x60] sm:$0xff]  ;;  %v1314_v28 = vld [vmem:[%s3140_s4 + $0x18] sm:$0xff]  ;;  %v1316_v29 = vld [vmem:[%s3140_s4 + $0x28] sm:$0xff] }
  0x19   : > { %v982_v30 = vld [vmem:[%s3138_s2 + $0x38] sm:$0xff]  ;;  %v331_v32 = vld [vmem:[%s3137_s1 + $0x50] sm:$0xff]  ;;  %v1320_v33 = vld [vmem:[%s3140_s4 + $0x48] sm:$0xff] }
  0x1a   : > { %768 = vperm.xlu0 %2103, %v326_v6   ;;  %2104 = vset.pattern.permute.xlu1 %v2181_v1  ;;  %v1318_v31 = vld [vmem:[%s3140_s4 + $0x38] sm:$0xff]  ;;  %v1324_v35 = vld [vmem:[%s3140_s4 + $0x68] sm:$0xff]  ;;  %v333_v40 = vld [vmem:[%s3137_s1 + $0x60] sm:$0xff] }
  0x1b   : > { %752 = vperm.xlu1 %2104, %v322_v4   ;;  %v1322_v34 = vld [vmem:[%s3140_s4 + $0x58] sm:$0xff]  ;;  %v984_v37 = vld [vmem:[%s3138_s2 + $0x48] sm:$0xff]  ;;  %v335_v57 = vld [vmem:[%s3137_s1 + $0x70] sm:$0xff] }
  0x1c   : > { %v1326_v36 = vld [vmem:[%s3140_s4 + $0x78] sm:$0xff]  ;;  %v319_v58 = vld [vmem:[%s2448_s22] sm:$0x77]  ;;  %v320_v59 = vld [vmem:[%s2448_s22 + $0x8] sm:$0x77] }
  0x1d   : > { %v986_v52 = vld [vmem:[%s3138_s2 + $0x58] sm:$0xff] }
  0x1e   : > { %2111 = vset.pattern.permute.xlu0 %v2182_v2 }
  0x1f   : > { %536 = vperm.xlu0 %2111, %v325_v7   ;;  %2105 = vset.pattern.permute.xlu1 %v3149_v5 }
  0x20   : > { %349 = vperm.xlu1 %2105, %v323_v3  }
  0x23   : > { %548 = vperm.xlu0 %2111, %v328_v8  }
  0x24   : > { %2106 = vset.pattern.permute.xlu1 %v2182_v2 }
  0x25   : > { %528 = vperm.xlu1 %2106, %v323_v3   ;;  %v586_v3 = vrot.slane %v319_v58, %v585_v55 }
  0x27   : > { %556 = vperm.xlu0 %2111, %v2287_v9  }
  0x29   : > { %532 = vperm.xlu1 %2106, %v324_v10  }
  0x2b   : > { %564 = vperm.xlu0 %2111, %v2296_v11  }
  0x2d   : > { %2107 = vset.pattern.permute.xlu1 %v2181_v1 }
  0x2e   : > { %760 = vperm.xlu1 %2107, %v324_v10  }
  0x2f   : > { %572 = vperm.xlu0 %2111, %v2302_v12  }
  0x32   : > { %2108 = vset.pattern.permute.xlu1 %v3149_v5 }
  0x33   : > { %580 = vperm.xlu0 %2111, %v2309_v13   ;;  %993 = vperm.xlu1 %2108, %v975_v14   ;;  %v426_v14 = vrot.slane %v319_v58, %v425_v63 }
  0x37   : > { %2126 = vset.pattern.permute.xlu0 %v3149_v5  ;;  %359 = vperm.xlu1 %2108, %v325_v7  }
  0x38   : > { %339 = vperm.xlu0 %2126, %v321_v0  }
  0x3b   : > { %364 = vperm.xlu1 %2108, %v326_v6  }
  0x3c   : > { %344 = vperm.xlu0 %2126, %v322_v4   ;;  %v590_v4 = vrot.slane %v319_v58, %v589_v56 }
  0x3f   : > { %2109 = vset.pattern.permute.xlu1 %v2182_v2 }
  0x40   : > { %354 = vperm.xlu0 %2126, %v324_v10   ;;  %540 = vperm.xlu1 %2109, %v326_v6   ;;  %v421_v6 = vsub.s32 0, %v420_v51  ;;  %v818_v10 = vrot.slane %v319_v58, %v817_v61 }
  0x44   : > { %998 = vperm.xlu0 %2126, %v976_v15   ;;  %2110 = vset.pattern.permute.xlu1 %v2181_v1  ;;  %v434_v15 = vrot.slane %v320_v59, %v425_v63 }
  0x45   : > { %764 = vperm.xlu1 %2110, %v325_v7   ;;  %v594_v7 = vrot.slane %v320_v59, %v585_v55 }
  0x48   : > { %369 = vperm.xlu0 %2126, %v327_v16  }
  0x49   : > { %2112 = vset.pattern.permute.xlu1 %v3149_v5 }
  0x4a   : > { %1003 = vperm.xlu1 %2112, %v977_v17  }
  0x4c   : > { %1013 = vperm.xlu0 %2126, %v979_v18   ;;  %v2467_v18 = vrot.slane %v586_v3, %v585_v55 }
  0x4e   : > { %1008 = vperm.xlu1 %2112, %v978_v19   ;;  %v2469_v19 = vrot.slane %v590_v4, %v585_v55 }
  0x50   : > { %384 = vperm.xlu0 %2126, %v2287_v9  }
  0x52   : > { %374 = vperm.xlu1 %2112, %v328_v8  }
  0x54   : > { %1023 = vperm.xlu0 %2126, %v981_v20   ;;  %v422_v20 = vrot.slane %v319_v58, %v421_v6 }
  0x56   : > { %2113 = vset.pattern.permute.xlu1 %v2182_v2 }
  0x57   : > { %544 = vperm.xlu1 %2113, %v327_v16  }
  0x58   : > { %394 = vperm.xlu0 %2126, %v2296_v11  }
  0x5b   : > { %2114 = vset.pattern.permute.xlu1 %v2181_v1 }
  0x5c   : > { %1033 = vperm.xlu0 %2126, %v983_v21   ;;  %772 = vperm.xlu1 %2114, %v327_v16   ;;  %v430_v21 = vrot.slane %v320_v59, %v421_v6 }
  0x60   : > { %404 = vperm.xlu0 %2126, %v2302_v12   ;;  %776 = vperm.xlu1 %2114, %v328_v8   ;;  %v598_v8 = vrot.slane %v320_v59, %v589_v56 }
  0x64   : > { %1043 = vperm.xlu0 %2126, %v985_v22   ;;  %2115 = vset.pattern.permute.xlu1 %v3149_v5  ;;  %v2471_v22 = vrot.slane %v594_v7, %v585_v55 }
  0x65   : > { %1018 = vperm.xlu1 %2115, %v980_v23   ;;  %v2473_v23 = vrot.slane %v598_v8, %v585_v55 }
  0x67   : > { %3158 = vst [vmem:[#allocation7_spill] sm:$0xff] %v2473_v23 }
  0x68   : > { %414 = vperm.xlu0 %2126, %v2309_v13  }
  0x69   : > { %379 = vperm.xlu1 %2115, %v329_v24  }
  0x6c   : > { %1053 = vperm.xlu0 %2126, %v987_v25   ;;  %v2477_v25 = vrot.slane %v818_v10, %v813_v60 }
  0x6d   : > { %2116 = vset.pattern.permute.xlu1 %v2182_v2 }
  0x6e   : > { %552 = vperm.xlu1 %2116, %v329_v24  }
  0x70   : > { %1068 = vperm.xlu0 %2126, %v990_v26  }
  0x72   : > { %2117 = vset.pattern.permute.xlu1 %v2181_v1 }
  0x73   : > { %780 = vperm.xlu1 %2117, %v329_v24  }
  0x74   : > { %1334 = vperm.xlu0 %2126, %v1312_v27   ;;  %v2483_v27 = vrot.slane %v426_v14, %v421_v6  ;;  %v988_v14 = vld [vmem:[%s3138_s2 + $0x68] sm:$0xff] }
  0x77   : > { %784 = vperm.xlu1 %2117, %v2287_v9   ;;  %v814_v9 = vrot.slane %v319_v58, %v813_v60 }
  0x78   : > { %1344 = vperm.xlu0 %2126, %v1314_v28   ;;  %v2485_v28 = vrot.slane %v434_v15, %v421_v6 }
  0x79   : > { %v2475_v24 = vrot.slane %v814_v9, %v813_v60 }
  0x7b   : > { %2118 = vset.pattern.permute.xlu1 %v3149_v5 }
  0x7c   : > { %1354 = vperm.xlu0 %2126, %v1316_v29   ;;  %1028 = vperm.xlu1 %2118, %v982_v30  }
  0x80   : > { %1364 = vperm.xlu0 %2126, %v1318_v31   ;;  %389 = vperm.xlu1 %2118, %v331_v32  }
  0x84   : > { %1374 = vperm.xlu0 %2126, %v1320_v33   ;;  %2119 = vset.pattern.permute.xlu1 %v2182_v2  ;;  %v2497_v33 = vrot.slane %v430_v21, %v421_v6 }
  0x85   : > { %560 = vperm.xlu1 %2119, %v331_v32  }
  0x88   : > { %1384 = vperm.xlu0 %2126, %v1322_v34  }
  0x89   : > { %2120 = vset.pattern.permute.xlu1 %v2181_v1 }
  0x8a   : > { %788 = vperm.xlu1 %2120, %v331_v32   ;;  %v2495_v32 = vrot.slane %v422_v20, %v421_v6 }
  0x8c   : > { %1394 = vperm.xlu0 %2126, %v1324_v35  }
  0x8e   : > { %792 = vperm.xlu1 %2120, %v2296_v11   ;;  %v822_v11 = vrot.slane %v320_v59, %v813_v60 }
  0x90   : > { %1404 = vperm.xlu0 %2126, %v1326_v36  }
  0x91   : > { %v2403_v38 = vpop.permute.xlu1 %520  ;;  %v2405_v39 = vpop.permute.xlu0 %748 }
  0x92   : > { %2121 = vset.pattern.permute.xlu1 %v3149_v5  ;;  %v2491_v30 = vmul.f32 %v2467_v18, %v2403_v38  ;;  %v620_v31 = vmul.f32 %v2469_v19, %v2403_v38  ;;  %v2502_v35 = vmul.f32 %v2471_v22, %v2403_v38  ;;  %v622_v36 = vmul.f32 %v2473_v23, %v2403_v38 }
  0x93   : > { %1038 = vperm.xlu1 %2121, %v984_v37   ;;  %v2510_v48 = vmul.f32 %v2475_v24, %v2405_v39  ;;  %v848_v51 = vmul.f32 %v2477_v25, %v2405_v39 }
  0x95   : > { %v2411_v41 = vpop.permute.xlu1 %524  ;;  %v2413_v42 = vpop.permute.xlu0 %756 }
  0x96   : > { %v2522_v38 = vmul.f32 %v2467_v18, %v2411_v41  ;;  %v624_v55 = vmul.f32 %v2469_v19, %v2411_v41  ;;  %v2528_v56 = vmul.f32 %v2471_v22, %v2411_v41 }
  0x97   : > { %399 = vperm.xlu1 %2121, %v333_v40  }
  0x99   : > { %v2417_v43 = vpop.permute.xlu0 %768 }
  0x9a   : > { %v2419_v44 = vpop.permute.xlu1 %752  ;;  %v2555_v7 = vmul.f32 %v2475_v24, %v2417_v43 }
  0x9b   : > { %2122 = vset.pattern.permute.xlu1 %v2182_v2  ;;  %v2571_v10 = vmul.f32 %v2475_v24, %v2419_v44 }
  0x9c   : > { %568 = vperm.xlu1 %2122, %v333_v40   ;;  %3159 = vst [vmem:[#allocation8_spill] sm:$0xff] %v2555_v7 }
  0x9e   : > { %v2423_v45 = vpop.permute.xlu0 %536 }
  0x9f   : > { %v2425_v46 = vpop.permute.xlu1 %349  ;;  %v2590_v15 = vmul.f32 %v2469_v19, %v2423_v45 }
  0xa0   : > { %2123 = vset.pattern.permute.xlu1 %v2181_v1 }
  0xa1   : > { %796 = vperm.xlu1 %2123, %v333_v40  }
  0xa2   : > { %v2428_v47 = vpop.permute.xlu0 %548 }
  0xa3   : > { %3153 = vst [vmem:[#allocation2_spill] sm:$0xff] %v2428_v47 }
  0xa4   : > { %v2432_v49 = vpop.permute.xlu1 %528 }
  0xa5   : > { %800 = vperm.xlu1 %2123, %v2302_v12   ;;  %v826_v12 = vrot.slane %v320_v59, %v817_v61  ;;  %v855_v59 = vmul.f32 %v2475_v24, %v2413_v42  ;;  %v627_v20 = vmul.f32 %v2467_v18, %v2432_v49  ;;  %v628_v21 = vmul.f32 %v2469_v19, %v2432_v49 }
  0xa6   : > { %v2436_v50 = vpop.permute.xlu0 %556  ;;  %v630_v47 = vmul.f32 %v2473_v23, %v2432_v49 }
  0xa7   : > { %3154 = vst [vmem:[#allocation3_spill] sm:$0xff] %v2436_v50  ;;  %v2481_v26 = vrot.slane %v826_v12, %v813_v60  ;;  %v629_v50 = vmul.f32 %v2471_v22, %v2432_v49  ;;  %v466_v49 = vmul.f32 %v2485_v28, %v2425_v46 }
  0xa8   : > { %v2441_v53 = vpop.permute.xlu1 %532 }
  0xa9   : > { %2124 = vset.pattern.permute.xlu1 %v3149_v5  ;;  %v2544_v61 = vmul.f32 %v2481_v26, %v2413_v42  ;;  %v2567_v9 = vmul.f32 %v2481_v26, %v2417_v43  ;;  %v854_v12 = vmul.f32 %v2481_v26, %v2419_v44 }
  0xaa   : > { %1048 = vperm.xlu1 %2124, %v986_v52   ;;  %v2451_v54 = vpop.permute.xlu0 %564  ;;  %v850_v52 = vmul.f32 %v2481_v26, %v2405_v39 }
  0xab   : > { %3155 = vst [vmem:[#allocation4_spill] sm:$0xff] %v2451_v54  ;;  %3162 = vst [vmem:[#allocation11_spill] sm:$0xff] %v2567_v9  ;;  %v464_v54 = vmul.f32 %v2483_v27, %v2425_v46 }
  0xad   : > { %v2458_v62 = vpop.permute.xlu1 %760 }
  0xae   : > { %409 = vperm.xlu1 %2124, %v335_v57   ;;  %v2460_v0 = vpop.permute.xlu0 %572 }
  0xaf   : > { %3156 = vst [vmem:[#allocation5_spill] sm:$0xff] %v2460_v0  ;;  %v463_v0 = vmul.f32 %v2495_v32, %v2425_v46 }
  0xb2   : > { %2125 = vset.pattern.permute.xlu1 %v2182_v2  ;;  %v2463_v16 = vpop.permute.xlu1 %993  ;;  %v2465_v17 = vpop.permute.xlu0 %580  ;;  %v2479_v2 = vrot.slane %v822_v11, %v813_v60 }
  0xb3   : > { %3157 = vst [vmem:[#allocation6_spill] sm:$0xff] %v2465_v17  ;;  %576 = vperm.xlu1 %2125, %v335_v57  }
  0xb4   : > { %v2540_v60 = vmul.f32 %v2479_v2, %v2413_v42  ;;  %v2563_v8 = vmul.f32 %v2479_v2, %v2417_v43  ;;  %v2577_v11 = vmul.f32 %v2479_v2, %v2419_v44 }
  0xb6   : > { %v2487_v29 = vpop.permute.xlu1 %359  ;;  %3161 = vst [vmem:[#allocation10_spill] sm:$0xff] %v2563_v8 }
  0xb7   : > { %v340_v34 = vpop.permute.xlu0 %339  ;;  %2127 = vset.pattern.permute.xlu1 %v2181_v1  ;;  %v2516_v1 = vmul.f32 %v2479_v2, %v2405_v39  ;;  %v856_v39 = vmul.f32 %v2477_v25, %v2413_v42  ;;  %v2559_v42 = vmul.f32 %v2477_v25, %v2417_v43  ;;  %v2586_v43 = vmul.f32 %v2467_v18, %v2423_v45 }
  0xb8   : > { %v456_v37 = vmul.f32 %v2483_v27, %v340_v34  ;;  %v458_v40 = vmul.f32 %v2485_v28, %v340_v34  ;;  %804 = vperm.xlu1 %2127, %v335_v57   ;;  %v626_v57 = vmul.f32 %v2473_v23, %v2411_v41 }
  0xb9   : > { %3160 = vst [vmem:[#allocation9_spill] sm:$0xff] %v2559_v42 }
  0xba   : > { %v2532_v58 = vpop.permute.xlu1 %364  ;;  %v684_v3 = vadd.f32 %v620_v31, %v456_v37  ;;  %v686_v41 = vadd.f32 %v622_v36, %v458_v40 }
  0xbb   : > { %v2546_v63 = vpop.permute.xlu0 %344 }
  0xbc   : > { %v460_v4 = vmul.f32 %v2483_v27, %v2546_v63  ;;  %v462_v6 = vmul.f32 %v2485_v28, %v2546_v63  ;;  %808 = vperm.xlu1 %2127, %v2309_v13   ;;  %v852_v13 = vmul.f32 %v2477_v25, %v2419_v44  ;;  %v912_v40 = vadd.f32 %v848_v51, %v684_v3  ;;  %v989_v3 = vld [vmem:[%s3138_s2 + $0x70] sm:$0xff] }
  0xbd   : > { %v914_v17 = vadd.f32 %v850_v52, %v686_v41  ;;  %v2615_v51 = vmul.f32 %v2473_v23, %v2423_v45  ;;  %v465_v52 = vmul.f32 %v2497_v33, %v2425_v46  ;;  %v691_v41 = vadd.f32 %v627_v20, %v463_v0 }
  0xbe   : > { %v688_v36 = vadd.f32 %v624_v55, %v460_v4  ;;  %v690_v37 = vadd.f32 %v626_v57, %v462_v6  ;;  %v2611_v55 = vmul.f32 %v2471_v22, %v2423_v45  ;;  %v455_v57 = vmul.f32 %v2495_v32, %v340_v34 }
  0xbf   : > { %v2596_v31 = vpop.permute.xlu0 %354  ;;  %v2598_v44 = vpop.permute.xlu1 %540  ;;  %3164 = vst [vmem:[#allocation13_spill] sm:$0xff] %v2615_v51  ;;  %v692_v4 = vadd.f32 %v628_v21, %v464_v54  ;;  %v457_v6 = vmul.f32 %v2497_v33, %v340_v34  ;;  %v1072_v9 = vadd.f32 %v2463_v16, %v912_v40  ;;  %v1074_v42 = vadd.f32 %v2463_v16, %v914_v17  ;;  %v1311_v34 = vld [vmem:[%s3140_s4] sm:$0xff] }
  0xc0   : > { %2128 = vset.pattern.permute.xlu1 %v3149_v5  ;;  %3163 = vst [vmem:[#allocation12_spill] sm:$0xff] %v2611_v55  ;;  %v916_v5 = vadd.f32 %v852_v13, %v688_v36  ;;  %v918_v8 = vadd.f32 %v854_v12, %v690_v37  ;;  %v693_v7 = vadd.f32 %v629_v50, %v465_v52 }
  0xc1   : > { %1058 = vperm.xlu1 %2128, %v988_v14   ;;  %v694_v51 = vadd.f32 %v630_v47, %v466_v49  ;;  %v631_v55 = vmul.f32 %v2467_v18, %v2441_v53  ;;  %v632_v46 = vmul.f32 %v2469_v19, %v2441_v53  ;;  %v633_v54 = vmul.f32 %v2471_v22, %v2441_v53 }
  0xc2   : > { %v683_v0 = vadd.f32 %v2491_v30, %v455_v57  ;;  %v634_v50 = vmul.f32 %v2473_v23, %v2441_v53  ;;  %v685_v13 = vadd.f32 %v2502_v35, %v457_v6  ;;  %v919_v12 = vadd.f32 %v855_v59, %v691_v41  ;;  %v1313_v57 = vld [vmem:[%s3140_s4 + $0x10] sm:$0xff] }
  0xc3   : > { %v2626_v14 = vpop.permute.xlu0 %998  ;;  %v920_v20 = vadd.f32 %v856_v39, %v692_v4  ;;  %v459_v21 = vmul.f32 %v2495_v32, %v2546_v63  ;;  %v468_v30 = vmul.f32 %v2483_v27, %v2596_v31  ;;  %v1136_v36 = vmul.f32 0.2, %v1072_v9 }
  0xc4   : > { %v2628_v45 = vpop.permute.xlu1 %764  ;;  %v1076_v17 = vadd.f32 %v2626_v14, %v916_v5  ;;  %v1078_v47 = vadd.f32 %v2626_v14, %v918_v8  ;;  %v1138_v37 = vmul.f32 0.2, %v1074_v42  ;;  %v461_v5 = vmul.f32 %v2497_v33, %v2546_v63 }
  0xc5   : > { %1063 = vperm.xlu1 %2128, %v989_v3   ;;  %v470_v8 = vmul.f32 %v2485_v28, %v2596_v31  ;;  %v859_v59 = vmul.f32 %v2475_v24, %v2458_v62  ;;  %v921_v39 = vadd.f32 %v2540_v60, %v693_v7  ;;  %v922_v52 = vadd.f32 %v2544_v61, %v694_v51 }
  0xc6   : > { %v1140_v40 = vmul.f32 0.2, %v1076_v17  ;;  %v1142_v35 = vmul.f32 0.2, %v1078_v47  ;;  %v911_v63 = vadd.f32 %v2510_v48, %v683_v0  ;;  %v467_v3 = vmul.f32 %v2495_v32, %v2596_v31 }
  0xc7   : > { %v913_v4 = vadd.f32 %v2516_v1, %v685_v13  ;;  %v687_v6 = vadd.f32 %v2522_v38, %v459_v21  ;;  %v1200_v23 = vmax.f32 %v1072_v9, %v1136_v36  ;;  %v1202_v60 = vmax.f32 %v1074_v42, %v1138_v37  ;;  %v1315_v42 = vld [vmem:[%s3140_s4 + $0x20] sm:$0xff] }
  0xc8   : > { %v1204_v49 = vmax.f32 %v1076_v17, %v1140_v40  ;;  %v1206_v41 = vmax.f32 %v1078_v47, %v1142_v35  ;;  %v860_v61 = vmul.f32 %v2477_v25, %v2458_v62  ;;  %v689_v7 = vadd.f32 %v2528_v56, %v461_v5  ;;  %v1317_v40 = vld [vmem:[%s3140_s4 + $0x30] sm:$0xff] }
  0xc9   : > { %1329 = vperm.xlu1 %2128, %v1311_v34   ;;  %v1004_v53 = vpop.permute.xlu1 %1003  ;;  %v696_v34 = vadd.f32 %v632_v46, %v468_v30  ;;  %v469_v48 = vmul.f32 %v2497_v33, %v2596_v31  ;;  %v698_v51 = vadd.f32 %v634_v50, %v470_v8  ;;  %v861_v17 = vmul.f32 %v2479_v2, %v2458_v62 }
  0xca   : > { %v1280_v1 = vpack.c.bf16 %v1204_v49, %v1200_v23  ;;  %v1282_v47 = vpack.c.bf16 %v1206_v41, %v1202_v60  ;;  %v1071_v38 = vadd.f32 %v2463_v16, %v911_v63  ;;  %v862_v56 = vmul.f32 %v2481_v26, %v2458_v62 }
  0xcb   : > { %v471_v9 = vmul.f32 %v2495_v32, %v2487_v29  ;;  %v695_v31 = vadd.f32 %v631_v55, %v467_v3  ;;  %v1073_v46 = vadd.f32 %v2463_v16, %v913_v4  ;;  %v472_v50 = vmul.f32 %v2483_v27, %v2487_v29 }
  0xcc   : > { %1455 = vmatprep.subr.bf16.mxu0 %v1280_v1  ;;  %1568 = vmatprep.subr.bf16.mxu1 %v1282_v47  ;;  %v924_v23 = vadd.f32 %v860_v61, %v696_v34  ;;  %v915_v13 = vadd.f32 %v2571_v10, %v687_v6  ;;  %v697_v21 = vadd.f32 %v633_v54, %v469_v48  ;;  %v1135_v8 = vmul.f32 0.2, %v1071_v38 }
  0xcd   : > { %1339 = vperm.xlu1 %2128, %v1313_v57   ;;  %v1009_v0 = vpop.permute.xlu1 %1008  ;;  %v1080_v30 = vadd.f32 %v1004_v53, %v920_v20  ;;  %v926_v36 = vadd.f32 %v862_v56, %v698_v51  ;;  %v917_v37 = vadd.f32 %v2577_v11, %v689_v7  ;;  %v1082_v5 = vadd.f32 %v1004_v53, %v922_v52 }
  0xce   : > { %v1084_v55 = vadd.f32 %v1009_v0, %v924_v23  ;;  %v1075_v16 = vadd.f32 %v2626_v14, %v915_v13  ;;  %v923_v35 = vadd.f32 %v859_v59, %v695_v31  ;;  %v1137_v54 = vmul.f32 0.2, %v1073_v46 }
  0xcf   : > { %v1086_v57 = vadd.f32 %v1009_v0, %v926_v36  ;;  %v1077_v10 = vadd.f32 %v2626_v14, %v917_v37  ;;  %v2696_v11 = vmul.f32 %v2497_v33, %v2487_v29  ;;  %v1079_v20 = vadd.f32 %v1004_v53, %v919_v12  ;;  %v1319_v14 = vld [vmem:[%s3140_s4 + $0x40] sm:$0xff] }
  0xd0   : > { %v2698_v63 = vadd.f32 %v1004_v53, %v921_v39  ;;  %v1139_v52 = vmul.f32 0.2, %v1075_v16  ;;  %v1144_v3 = vmul.f32 0.2, %v1080_v30  ;;  %v925_v49 = vadd.f32 %v861_v17, %v697_v21 }
  0xd1   : > { %1349 = vperm.xlu1 %2128, %v1315_v42   ;;  %v2687_v62 = vpop.permute.xlu1 %374  ;;  %v1083_v41 = vadd.f32 %v1009_v0, %v923_v35  ;;  %v1141_v4 = vmul.f32 0.2, %v1077_v10  ;;  %v1146_v6 = vmul.f32 0.2, %v1082_v5  ;;  %v1148_v34 = vmul.f32 0.2, %v1084_v55 }
  0xd2   : > { %v1199_v59 = vmax.f32 %v1071_v38, %v1135_v8  ;;  %v1203_v60 = vmax.f32 %v1075_v16, %v1139_v52  ;;  %v1085_v7 = vadd.f32 %v1009_v0, %v925_v49  ;;  %v1150_v12 = vmul.f32 0.2, %v1086_v57  ;;  %v2711_v38 = vpop.permute.xlu0 %369  ;;  %v3165_v16 = vld [vmem:[#allocation7_spill] sm:$0xff] }
  0xd3   : > { %v1201_v53 = vmax.f32 %v1073_v46, %v1137_v54  ;;  %v1205_v39 = vmax.f32 %v1077_v10, %v1141_v4  ;;  %v474_v48 = vmul.f32 %v2485_v28, %v2487_v29  ;;  %v699_v51 = vadd.f32 %v2586_v43, %v471_v9 }
  0xd4   : > { %v700_v17 = vadd.f32 %v2590_v15, %v472_v50  ;;  %v1279_v1 = vpack.c.bf16 %v1203_v60, %v1199_v59  ;;  %v475_v47 = vmul.f32 %v2495_v32, %v2532_v58  ;;  %v1143_v42 = vmul.f32 0.2, %v1079_v20  ;;  %v1321_v15 = vld [vmem:[%s3140_s4 + $0x50] sm:$0xff] }
  0xd5   : > { %1359 = vperm.xlu1 %2128, %v1317_v40   ;;  %v1147_v56 = vmul.f32 0.2, %v1083_v41  ;;  %v1281_v31 = vpack.c.bf16 %v1205_v39, %v1201_v53  ;;  %v476_v0 = vmul.f32 %v2483_v27, %v2532_v58  ;;  %v639_v29 = vmul.f32 %v2467_v18, %v2598_v44 }
  0xd6   : > { %v2700_v61 = vpop.permute.xlu1 %544  ;;  %1456 = vmatpush1.bf16.msra.mxu0 %v1279_v1  ;;  %v1208_v43 = vmax.f32 %v1080_v30, %v1144_v3  ;;  %v1212_v9 = vmax.f32 %v1084_v55, %v1148_v34  ;;  %v1145_v46 = vmul.f32 0.2, %v2698_v63  ;;  %v1149_v50 = vmul.f32 0.2, %v1085_v7  ;;  %v1014_v3 = vpop.permute.xlu0 %1013  ;;  %v3166_v34 = vld [vmem:[#allocation12_spill] sm:$0xff] }
  0xd7   : > { %1569 = vmatpush1.bf16.msra.mxu1 %v1281_v31  ;;  %v1210_v23 = vmax.f32 %v1082_v5, %v1146_v6  ;;  %v1214_v13 = vmax.f32 %v1086_v57, %v1150_v12  ;;  %v640_v36 = vmul.f32 %v2469_v19, %v2598_v44  ;;  %v641_v37 = vmul.f32 %v2471_v22, %v2598_v44  ;;  %v1323_v6 = vld [vmem:[%s3140_s4 + $0x60] sm:$0xff]  ;;  %v1325_v31 = vld [vmem:[%s3140_s4 + $0x70] sm:$0xff] }
  0xd8   : > { %v863_v30 = vmul.f32 %v2475_v24, %v2628_v45  ;;  %v1284_v55 = vpack.c.bf16 %v1212_v9, %v1208_v43  ;;  %v642_v8 = vmul.f32 %v3165_v16, %v2598_v44  ;;  %v1207_v35 = vmax.f32 %v1079_v20, %v1143_v42 }
  0xd9   : > { %1369 = vperm.xlu1 %2128, %v1319_v14   ;;  %v1286_v40 = vpack.c.bf16 %v1214_v13, %v1210_v23  ;;  %v1211_v10 = vmax.f32 %v1083_v41, %v1147_v56  ;;  %v477_v5 = vmul.f32 %v2497_v33, %v2532_v58  ;;  %v864_v57 = vmul.f32 %v2477_v25, %v2628_v45 }
  0xda   : > { %v865_v54 = vmul.f32 %v2479_v2, %v2628_v45  ;;  %v866_v52 = vmul.f32 %v2481_v26, %v2628_v45  ;;  %1457 = vmatprep.subr.bf16.mxu0 %v1284_v55  ;;  %v478_v44 = vmul.f32 %v2485_v28, %v2532_v58  ;;  %v1209_v49 = vmax.f32 %v2698_v63, %v1145_v46  ;;  %v3167_v45 = vld [vmem:[#allocation13_spill] sm:$0xff]  ;;  %v1842_v55 = vld [vmem:[%s3142_s6] sm:$0x7] }
  0xdb   : > { %v2721_v21 = vpop.permute.xlu1 %772  ;;  %1570 = vmatprep.subr.bf16.mxu1 %v1286_v40  ;;  %v1283_v20 = vpack.c.bf16 %v1211_v10, %v1207_v35  ;;  %v1213_v41 = vmax.f32 %v1085_v7, %v1149_v50  ;;  %v701_v59 = vadd.f32 %v3166_v34, %v2696_v11  ;;  %v702_v60 = vadd.f32 %v3167_v45, %v474_v48 }
  0xdc   : > { %v703_v14 = vadd.f32 %v639_v29, %v475_v47  ;;  %v927_v12 = vadd.f32 %v863_v30, %v699_v51  ;;  %v704_v58 = vadd.f32 %v640_v36, %v476_v0  ;;  %v705_v53 = vadd.f32 %v641_v37, %v477_v5  ;;  %v3168_v51 = vld [vmem:[#allocation8_spill] sm:$0xff]  ;;  %v3169_v29 = vld [vmem:[#allocation9_spill] sm:$0xff] }
  0xdd   : > { %1379 = vperm.xlu1 %2128, %v1321_v15   ;;  %v706_v39 = vadd.f32 %v642_v8, %v478_v44  ;;  %1458 = vmatpush1.bf16.msra.mxu0 %v1283_v20  ;;  %v1285_v1 = vpack.c.bf16 %v1213_v41, %v1209_v49  ;;  %v928_v63 = vadd.f32 %v864_v57, %v700_v17  ;;  %v3170_v15 = vld [vmem:[#allocation10_spill] sm:$0xff]  ;;  %v3171_v17 = vld [vmem:[#allocation11_spill] sm:$0xff] }
  0xde   : > { %v929_v7 = vadd.f32 %v865_v54, %v701_v59  ;;  %v930_v42 = vadd.f32 %v866_v52, %v702_v60  ;;  %v1087_v56 = vadd.f32 %v1014_v3, %v927_v12  ;;  %v931_v0 = vadd.f32 %v3168_v51, %v703_v14 }
  0xdf   : > { %v2742_v4 = vpop.permute.xlu1 %776  ;;  %1571 = vmatpush1.bf16.msra.mxu1 %v1285_v1  ;;  %v1088_v11 = vadd.f32 %v1014_v3, %v928_v63  ;;  %v932_v9 = vadd.f32 %v3169_v29, %v704_v58  ;;  %v933_v46 = vadd.f32 %v3170_v15, %v705_v53  ;;  %v934_v50 = vadd.f32 %v3171_v17, %v706_v39 }
  0xe0   : > { %v1089_v43 = vadd.f32 %v1014_v3, %v929_v7  ;;  %v1090_v48 = vadd.f32 %v1014_v3, %v930_v42  ;;  %v1151_v23 = vmul.f32 0.2, %v1087_v56  ;;  %v479_v5 = vmul.f32 %v2495_v32, %v2711_v38 }
  0xe1   : > { %1389 = vperm.xlu1 %2128, %v1323_v6   ;;  %v1152_v8 = vmul.f32 0.2, %v1088_v11  ;;  %v480_v44 = vmul.f32 %v2483_v27, %v2711_v38  ;;  %v481_v3 = vmul.f32 %v2497_v33, %v2711_v38  ;;  %v482_v20 = vmul.f32 %v2485_v28, %v2711_v38 }
  0xe2   : > { %v1153_v40 = vmul.f32 0.2, %v1089_v43  ;;  %v1154_v35 = vmul.f32 0.2, %v1090_v48  ;;  %v643_v41 = vmul.f32 %v2467_v18, %v2700_v61  ;;  %v644_v6 = vmul.f32 %v2469_v19, %v2700_v61 }
  0xe3   : > { %v645_v34 = vmul.f32 %v2471_v22, %v2700_v61  ;;  %v646_v59 = vmul.f32 %v3165_v16, %v2700_v61  ;;  %v1216_v38 = vmax.f32 %v1088_v11, %v1152_v8  ;;  %v1215_v39 = vmax.f32 %v1087_v56, %v1151_v23  ;;  %v3172_v56 = vld [vmem:[#allocation2_spill] sm:$0xff] }
  0xe4   : > { %v1019_v47 = vpop.permute.xlu1 %1018  ;;  %v1218_v53 = vmax.f32 %v1090_v48, %v1154_v35  ;;  %v1217_v1 = vmax.f32 %v1089_v43, %v1153_v40  ;;  %v871_v63 = vmul.f32 %v2475_v24, %v2721_v21  ;;  %v872_v7 = vmul.f32 %v2477_v25, %v2721_v21 }
  0xe5   : > { %1399 = vperm.xlu1 %2128, %v1325_v31   ;;  %v1091_v13 = vadd.f32 %v1019_v47, %v931_v0  ;;  %v1092_v36 = vadd.f32 %v1019_v47, %v932_v9  ;;  %v1093_v37 = vadd.f32 %v1019_v47, %v933_v46  ;;  %v1094_v30 = vadd.f32 %v1019_v47, %v934_v50  ;;  %v2788_v31 = vpop.permute.xlu0 %384 }
  0xe6   : > { %v873_v42 = vmul.f32 %v2479_v2, %v2721_v21  ;;  %v874_v61 = vmul.f32 %v2481_v26, %v2721_v21  ;;  %v647_v43 = vmul.f32 %v2467_v18, %v3172_v56  ;;  %v708_v0 = vadd.f32 %v644_v6, %v480_v44 }
  0xe7   : > { %v1155_v57 = vmul.f32 0.2, %v1091_v13  ;;  %v1156_v54 = vmul.f32 0.2, %v1092_v36  ;;  %v1157_v52 = vmul.f32 0.2, %v1093_v37  ;;  %v707_v29 = vadd.f32 %v643_v41, %v479_v5 }
  0xe8   : > { %v2760_v10 = vpop.permute.xlu1 %379  ;;  %v1158_v49 = vmul.f32 0.2, %v1094_v30  ;;  %v709_v9 = vadd.f32 %v645_v34, %v481_v3  ;;  %v710_v15 = vadd.f32 %v646_v59, %v482_v20  ;;  %v648_v46 = vmul.f32 %v2469_v19, %v3172_v56 }
  0xe9   : > { %1845 = vperm.xlu1 %2128, %v1842_v55   ;;  %v1220_v45 = vmax.f32 %v1092_v36, %v1156_v54  ;;  %v1219_v14 = vmax.f32 %v1091_v13, %v1155_v57  ;;  %v1221_v12 = vmax.f32 %v1093_v37, %v1157_v52  ;;  %v649_v21 = vmul.f32 %v2471_v22, %v3172_v56  ;;  %v1024_v35 = vpop.permute.xlu0 %1023 }
  0xea   : > { %v1222_v60 = vmax.f32 %v1094_v30, %v1158_v49  ;;  %v936_v17 = vadd.f32 %v872_v7, %v708_v0  ;;  %v483_v23 = vmul.f32 %v2495_v32, %v2687_v62  ;;  %v935_v13 = vadd.f32 %v871_v63, %v707_v29 }
  0xeb   : > { %v1288_v47 = vpack.c.bf16 %v1220_v45, %v1216_v38  ;;  %v1287_v11 = vpack.c.bf16 %v1219_v14, %v1215_v39  ;;  %v1289_v48 = vpack.c.bf16 %v1221_v12, %v1217_v1  ;;  %v937_v36 = vadd.f32 %v873_v42, %v709_v9 }
  0xec   : > { %v1290_v51 = vpack.c.bf16 %v1222_v60, %v1218_v53  ;;  %v938_v37 = vadd.f32 %v874_v61, %v710_v15  ;;  %v650_v30 = vmul.f32 %v3165_v16, %v3172_v56  ;;  %v484_v55 = vmul.f32 %v2483_v27, %v2687_v62 }
  0xed   : > { %v2778_v58 = vpop.permute.xlu1 %552  ;;  %1459 = vmatprep.subr.bf16.mxu0 %v1288_v47  ;;  %v485_v8 = vmul.f32 %v2497_v33, %v2687_v62  ;;  %v486_v40 = vmul.f32 %v2485_v28, %v2687_v62  ;;  %v875_v5 = vmul.f32 %v2475_v24, %v2742_v4  ;;  %v876_v57 = vmul.f32 %v2477_v25, %v2742_v4 }
  0xee   : > { %1572 = vmatprep.subr.bf16.mxu1 %v1290_v51  ;;  %1460 = vmatpush1.bf16.msra.mxu0 %v1287_v11  ;;  %v877_v54 = vmul.f32 %v2479_v2, %v2742_v4  ;;  %v878_v52 = vmul.f32 %v2481_v26, %v2742_v4  ;;  %v1096_v3 = vadd.f32 %v1024_v35, %v936_v17 }
  0xef   : > { %1573 = vmatpush1.bf16.msra.mxu1 %v1289_v48  ;;  %v711_v20 = vadd.f32 %v647_v43, %v483_v23  ;;  %v1098_v49 = vadd.f32 %v1024_v35, %v938_v37  ;;  %v1095_v41 = vadd.f32 %v1024_v35, %v935_v13  ;;  %v1097_v62 = vadd.f32 %v1024_v35, %v937_v36  ;;  %v3173_v48 = vld [vmem:[#allocation3_spill] sm:$0xff] }
  0xf0   : > { %v712_v6 = vadd.f32 %v648_v46, %v484_v55  ;;  %v713_v34 = vadd.f32 %v649_v21, %v485_v8  ;;  %v714_v59 = vadd.f32 %v650_v30, %v486_v40  ;;  %v1160_v38 = vmul.f32 0.2, %v1096_v3 }
  0xf1   : > { %v939_v45 = vadd.f32 %v875_v5, %v711_v20  ;;  %v1162_v39 = vmul.f32 0.2, %v1098_v49  ;;  %v1159_v1 = vmul.f32 0.2, %v1095_v41  ;;  %v1161_v63 = vmul.f32 0.2, %v1097_v62 }
  0xf2   : > { %v2796_v50 = vpop.permute.xlu1 %780  ;;  %v940_v60 = vadd.f32 %v876_v57, %v712_v6  ;;  %v941_v14 = vadd.f32 %v877_v54, %v713_v34  ;;  %v942_v12 = vadd.f32 %v878_v52, %v714_v59  ;;  %v655_v56 = vmul.f32 %v2467_v18, %v3173_v48  ;;  %v2846_v6 = vpop.permute.xlu0 %394 }
  0xf3   : > { %v656_v43 = vmul.f32 %v2469_v19, %v3173_v48  ;;  %v657_v0 = vmul.f32 %v2471_v22, %v3173_v48  ;;  %v1224_v15 = vmax.f32 %v1096_v3, %v1160_v38  ;;  %v1226_v46 = vmax.f32 %v1098_v49, %v1162_v39 }
  0xf4   : > { %v1223_v21 = vmax.f32 %v1095_v41, %v1159_v1  ;;  %v1225_v17 = vmax.f32 %v1097_v62, %v1161_v63  ;;  %v488_v30 = vmul.f32 %v2483_v27, %v2760_v10  ;;  %v651_v55 = vmul.f32 %v2467_v18, %v2778_v58 }
  0xf5   : > { %v652_v8 = vmul.f32 %v2469_v19, %v2778_v58  ;;  %v654_v40 = vmul.f32 %v3165_v16, %v2778_v58  ;;  %v490_v52 = vmul.f32 %v2485_v28, %v2760_v10  ;;  %v653_v3 = vmul.f32 %v2471_v22, %v2778_v58 }
  0xf6   : > { %v2816_v44 = vpop.permute.xlu1 %784  ;;  %v880_v20 = vmul.f32 %v2477_v25, %v2796_v50  ;;  %v882_v49 = vmul.f32 %v2481_v26, %v2796_v50  ;;  %v658_v62 = vmul.f32 %v3165_v16, %v3173_v48  ;;  %v487_v34 = vmul.f32 %v2495_v32, %v2760_v10 }
  0xf7   : > { %v489_v59 = vmul.f32 %v2497_v33, %v2760_v10  ;;  %v879_v58 = vmul.f32 %v2475_v24, %v2796_v50  ;;  %v492_v38 = vmul.f32 %v2483_v27, %v2788_v31  ;;  %v493_v10 = vmul.f32 %v2497_v33, %v2788_v31 }
  0xf8   : > { %v494_v39 = vmul.f32 %v2485_v28, %v2788_v31 }
  0xf9   : > { %v717_v1 = vadd.f32 %v653_v3, %v489_v59 }
  0xfa   : > { %v722_v48 = vadd.f32 %v658_v62, %v494_v39 }
  0xfb   : > { %v1029_v53 = vpop.permute.xlu1 %1028 }
  0xfc   : > { %v1099_v4 = vadd.f32 %v1029_v53, %v939_v45  ;;  %v1100_v7 = vadd.f32 %v1029_v53, %v940_v60  ;;  %v1101_v42 = vadd.f32 %v1029_v53, %v941_v14  ;;  %v1102_v61 = vadd.f32 %v1029_v53, %v942_v12 }
  0xfd   : > { %v716_v45 = vadd.f32 %v652_v8, %v488_v30  ;;  %v718_v60 = vadd.f32 %v654_v40, %v490_v52  ;;  %v881_v14 = vmul.f32 %v2479_v2, %v2796_v50  ;;  %v491_v12 = vmul.f32 %v2495_v32, %v2788_v31 }
  0xfe   : > { %v1163_v47 = vmul.f32 0.2, %v1099_v4  ;;  %v1164_v51 = vmul.f32 0.2, %v1100_v7  ;;  %v1165_v11 = vmul.f32 0.2, %v1101_v42  ;;  %v715_v53 = vadd.f32 %v651_v55, %v487_v34 }
  0xff   : > { %v1166_v29 = vmul.f32 0.2, %v1102_v61  ;;  %v2824_v9 = vpop.permute.xlu1 %389  ;;  %v944_v63 = vadd.f32 %v880_v20, %v716_v45  ;;  %v884_v31 = vmul.f32 %v2477_v25, %v2816_v44 }
 0x100   : > { %v1228_v23 = vmax.f32 %v1100_v7, %v1164_v51  ;;  %v1227_v36 = vmax.f32 %v1099_v4, %v1163_v47  ;;  %v1229_v37 = vmax.f32 %v1101_v42, %v1165_v11  ;;  %v946_v4 = vadd.f32 %v882_v49, %v718_v60  ;;  %v1034_v11 = vpop.permute.xlu0 %1033 }
 0x101   : > { %v1230_v13 = vmax.f32 %v1102_v61, %v1166_v29  ;;  %v943_v50 = vadd.f32 %v879_v58, %v715_v53  ;;  %v945_v42 = vadd.f32 %v881_v14, %v717_v1  ;;  %v719_v61 = vadd.f32 %v655_v56, %v491_v12 }
 0x102   : > { %v1292_v35 = vpack.c.bf16 %v1228_v23, %v1224_v15  ;;  %v1291_v57 = vpack.c.bf16 %v1227_v36, %v1223_v21  ;;  %v1293_v54 = vpack.c.bf16 %v1229_v37, %v1225_v17  ;;  %v720_v47 = vadd.f32 %v656_v43, %v492_v38 }
 0x103   : > { %v1294_v5 = vpack.c.bf16 %v1230_v13, %v1226_v46  ;;  %v721_v51 = vadd.f32 %v657_v0, %v493_v10  ;;  %v883_v29 = vmul.f32 %v2475_v24, %v2816_v44  ;;  %v1104_v15 = vadd.f32 %v1034_v11, %v944_v63 }
 0x104   : > { %v2842_v41 = vpop.permute.xlu1 %560  ;;  %1461 = vmatprep.subr.bf16.mxu0 %v1292_v35  ;;  %v1106_v46 = vadd.f32 %v1034_v11, %v946_v4  ;;  %v885_v21 = vmul.f32 %v2479_v2, %v2816_v44  ;;  %v886_v17 = vmul.f32 %v2481_v26, %v2816_v44  ;;  %v1103_v56 = vadd.f32 %v1034_v11, %v943_v50 }
 0x105   : > { %1574 = vmatprep.subr.bf16.mxu1 %v1294_v5  ;;  %1462 = vmatpush1.bf16.msra.mxu0 %v1291_v57  ;;  %v1105_v43 = vadd.f32 %v1034_v11, %v945_v42  ;;  %v947_v0 = vadd.f32 %v883_v29, %v719_v61  ;;  %v1168_v13 = vmul.f32 0.2, %v1104_v15  ;;  %v948_v37 = vadd.f32 %v884_v31, %v720_v47 }
 0x106   : > { %1575 = vmatpush1.bf16.msra.mxu1 %v1293_v54  ;;  %v1170_v36 = vmul.f32 0.2, %v1106_v46  ;;  %v949_v30 = vadd.f32 %v885_v21, %v721_v51  ;;  %v950_v55 = vadd.f32 %v886_v17, %v722_v48  ;;  %v1167_v8 = vmul.f32 0.2, %v1103_v56  ;;  %v2904_v21 = vpop.permute.xlu0 %404 }
 0x107   : > { %v1169_v35 = vmul.f32 0.2, %v1105_v43  ;;  %v1232_v3 = vmax.f32 %v1104_v15, %v1168_v13  ;;  %v495_v59 = vmul.f32 %v2495_v32, %v2824_v9  ;;  %v496_v58 = vmul.f32 %v2483_v27, %v2824_v9  ;;  %v3174_v15 = vld [vmem:[#allocation4_spill] sm:$0xff] }
 0x108   : > { %v1234_v20 = vmax.f32 %v1106_v46, %v1170_v36  ;;  %v1231_v34 = vmax.f32 %v1103_v56, %v1167_v8  ;;  %v498_v12 = vmul.f32 %v2485_v28, %v2824_v9  ;;  %v659_v38 = vmul.f32 %v2467_v18, %v2842_v41 }
 0x109   : > { %v2864_v7 = vpop.permute.xlu1 %788  ;;  %v1233_v14 = vmax.f32 %v1105_v43, %v1169_v35  ;;  %v660_v10 = vmul.f32 %v2469_v19, %v2842_v41  ;;  %v662_v53 = vmul.f32 %v3165_v16, %v2842_v41  ;;  %v661_v50 = vmul.f32 %v2471_v22, %v2842_v41 }
 0x10a   : > { %v887_v42 = vmul.f32 %v2475_v24, %v2864_v7  ;;  %v888_v61 = vmul.f32 %v2477_v25, %v2864_v7  ;;  %v890_v47 = vmul.f32 %v2481_v26, %v2864_v7  ;;  %v663_v46 = vmul.f32 %v2467_v18, %v3174_v15 }
 0x10b   : > { %v664_v31 = vmul.f32 %v2469_v19, %v3174_v15  ;;  %v665_v41 = vmul.f32 %v2471_v22, %v3174_v15  ;;  %v497_v17 = vmul.f32 %v2497_v33, %v2824_v9  ;;  %v723_v43 = vadd.f32 %v659_v38, %v495_v59 }
 0x10c   : > { %v726_v13 = vadd.f32 %v662_v53, %v498_v12  ;;  %v889_v36 = vmul.f32 %v2479_v2, %v2864_v7  ;;  %v3176_v53 = vld [vmem:[#allocation6_spill] sm:$0xff] }
 0x10d   : > { %v2874_v23 = vpop.permute.xlu1 %792  ;;  %v725_v9 = vadd.f32 %v661_v50, %v497_v17  ;;  %v951_v8 = vadd.f32 %v887_v42, %v723_v43 }
 0x10e   : > { %v954_v35 = vadd.f32 %v890_v47, %v726_v13 }
 0x112   : > { %v1039_v40 = vpop.permute.xlu1 %1038 }
 0x113   : > { %v1107_v5 = vadd.f32 %v1039_v40, %v947_v0  ;;  %v1108_v57 = vadd.f32 %v1039_v40, %v948_v37  ;;  %v1109_v54 = vadd.f32 %v1039_v40, %v949_v30  ;;  %v1110_v52 = vadd.f32 %v1039_v40, %v950_v55 }
 0x114   : > { %v724_v0 = vadd.f32 %v660_v10, %v496_v58  ;;  %v666_v37 = vmul.f32 %v3165_v16, %v3174_v15  ;;  %v499_v30 = vmul.f32 %v2495_v32, %v2846_v6  ;;  %v500_v55 = vmul.f32 %v2483_v27, %v2846_v6  ;;  %v1044_v58 = vpop.permute.xlu0 %1043 }
 0x115   : > { %v1171_v44 = vmul.f32 0.2, %v1107_v5  ;;  %v1172_v49 = vmul.f32 0.2, %v1108_v57  ;;  %v1173_v62 = vmul.f32 0.2, %v1109_v54  ;;  %v2946_v38 = vadd.f32 %v1044_v58, %v954_v35 }
 0x116   : > { %v1174_v45 = vmul.f32 0.2, %v1110_v52  ;;  %v2880_v60 = vpop.permute.xlu1 %399  ;;  %v952_v40 = vadd.f32 %v888_v61, %v724_v0  ;;  %v727_v59 = vadd.f32 %v663_v46, %v499_v30  ;;  %v2948_v10 = vadd.f32 %v1044_v58, %v951_v8 }
 0x117   : > { %v1236_v39 = vmax.f32 %v1108_v57, %v1172_v49  ;;  %v1235_v63 = vmax.f32 %v1107_v5, %v1171_v44  ;;  %v1237_v4 = vmax.f32 %v1109_v54, %v1173_v62  ;;  %v3175_v5 = vld [vmem:[#allocation5_spill] sm:$0xff]  ;;  %v501_v54 = vmul.f32 %v2497_v33, %v2846_v6 }
 0x118   : > { %v1238_v1 = vmax.f32 %v1110_v52, %v1174_v45  ;;  %v2918_v7 = vmul.f32 %v2467_v18, %v3175_v5  ;;  %v2922_v57 = vmul.f32 %v2469_v19, %v3175_v5  ;;  %v502_v52 = vmul.f32 %v2485_v28, %v2846_v6 }
 0x119   : > { %v1296_v51 = vpack.c.bf16 %v1236_v39, %v1232_v3  ;;  %v1295_v48 = vpack.c.bf16 %v1235_v63, %v1231_v34  ;;  %v1297_v29 = vpack.c.bf16 %v1237_v4, %v1233_v14  ;;  %v2930_v3 = vmul.f32 %v2471_v22, %v3175_v5 }
 0x11a   : > { %v1298_v11 = vpack.c.bf16 %v1238_v1, %v1234_v20  ;;  %v953_v20 = vadd.f32 %v889_v36, %v725_v9  ;;  %v891_v44 = vmul.f32 %v2475_v24, %v2874_v23  ;;  %v892_v49 = vmul.f32 %v2477_v25, %v2874_v23  ;;  %v415_v9 = vpop.permute.xlu0 %414 }
 0x11b   : > { %v569_v56 = vpop.permute.xlu1 %568  ;;  %1463 = vmatprep.subr.bf16.mxu0 %v1296_v51  ;;  %v2938_v34 = vmul.f32 %v3165_v16, %v3175_v5  ;;  %v893_v6 = vmul.f32 %v2479_v2, %v2874_v23  ;;  %v894_v45 = vmul.f32 %v2481_v26, %v2874_v23  ;;  %v728_v14 = vadd.f32 %v664_v31, %v500_v55 }
 0x11c   : > { %1576 = vmatprep.subr.bf16.mxu1 %v1298_v11  ;;  %1464 = vmatpush1.bf16.msra.mxu0 %v1295_v48  ;;  %v2944_v12 = vadd.f32 %v1044_v58, %v952_v40  ;;  %v2952_v39 = vmul.f32 %v2467_v18, %v3176_v53  ;;  %v2956_v1 = vmul.f32 %v2469_v19, %v3176_v53  ;;  %v1178_v31 = vmul.f32 0.2, %v2946_v38 }
 0x11d   : > { %1577 = vmatpush1.bf16.msra.mxu1 %v1297_v29  ;;  %v729_v63 = vadd.f32 %v665_v41, %v501_v54  ;;  %v730_v4 = vadd.f32 %v666_v37, %v502_v52  ;;  %v2960_v23 = vmul.f32 %v2471_v22, %v3176_v53  ;;  %v955_v42 = vadd.f32 %v891_v44, %v727_v59 }
 0x11e   : > { %v956_v61 = vadd.f32 %v892_v49, %v728_v14  ;;  %v1113_v47 = vadd.f32 %v1044_v58, %v953_v20  ;;  %v668_v51 = vmul.f32 %v2469_v19, %v569_v56  ;;  %v670_v11 = vmul.f32 %v3165_v16, %v569_v56 }
 0x11f   : > { %v957_v48 = vadd.f32 %v893_v6, %v729_v63  ;;  %v958_v29 = vadd.f32 %v894_v45, %v730_v4  ;;  %v504_v15 = vmul.f32 %v2483_v27, %v2880_v60  ;;  %v1176_v46 = vmul.f32 0.2, %v2944_v12 }
 0x120   : > { %v797_v62 = vpop.permute.xlu1 %796  ;;  %v1175_v41 = vmul.f32 0.2, %v2948_v10  ;;  %v506_v17 = vmul.f32 %v2485_v28, %v2880_v60  ;;  %v667_v43 = vmul.f32 %v2467_v18, %v569_v56  ;;  %v669_v0 = vmul.f32 %v2471_v22, %v569_v56 }
 0x121   : > { %v896_v13 = vmul.f32 %v2477_v25, %v797_v62  ;;  %v503_v36 = vmul.f32 %v2495_v32, %v2880_v60  ;;  %v505_v37 = vmul.f32 %v2497_v33, %v2880_v60  ;;  %v898_v30 = vmul.f32 %v2481_v26, %v797_v62 }
 0x122   : > { %v1177_v55 = vmul.f32 0.2, %v1113_v47  ;;  %v732_v8 = vadd.f32 %v668_v51, %v504_v15  ;;  %v734_v40 = vadd.f32 %v670_v11, %v506_v17  ;;  %v895_v35 = vmul.f32 %v2475_v24, %v797_v62  ;;  %v1054_v15 = vpop.permute.xlu0 %1053 }
 0x123   : > { %v897_v5 = vmul.f32 %v2479_v2, %v797_v62  ;;  %v682_v49 = vmul.f32 %v3165_v16, %v3176_v53  ;;  %v731_v59 = vadd.f32 %v667_v43, %v503_v36  ;;  %v733_v60 = vadd.f32 %v669_v0, %v505_v37 }
 0x124   : > { %v2962_v50 = vpop.permute.xlu1 %800  ;;  %v960_v58 = vadd.f32 %v896_v13, %v732_v8  ;;  %v962_v6 = vadd.f32 %v898_v30, %v734_v40  ;;  %v507_v4 = vmul.f32 %v2495_v32, %v2904_v21  ;;  %v1239_v53 = vmax.f32 %v2948_v10, %v1175_v41 }
 0x125   : > { %v959_v11 = vadd.f32 %v895_v35, %v731_v59  ;;  %v508_v36 = vmul.f32 %v2483_v27, %v2904_v21  ;;  %v509_v37 = vmul.f32 %v2497_v33, %v2904_v21  ;;  %v515_v41 = vmul.f32 %v2495_v32, %v415_v9 }
 0x126   : > { %v2996_v30 = vadd.f32 %v1054_v15, %v960_v58  ;;  %v516_v35 = vmul.f32 %v2483_v27, %v415_v9 }
 0x127   : > { %v3003_v8 = vadd.f32 %v1054_v15, %v959_v11  ;;  %v736_v59 = vadd.f32 %v2922_v57, %v508_v36  ;;  %v737_v58 = vadd.f32 %v2930_v3, %v509_v37 }
 0x128   : > { %v744_v57 = vadd.f32 %v2956_v1, %v516_v35 }
 0x129   : > { %v1049_v54 = vpop.permute.xlu1 %1048 }
 0x12a   : > { %v1115_v56 = vadd.f32 %v1049_v54, %v955_v42  ;;  %v1116_v52 = vadd.f32 %v1049_v54, %v956_v61  ;;  %v1117_v20 = vadd.f32 %v1049_v54, %v957_v48  ;;  %v1118_v44 = vadd.f32 %v1049_v54, %v958_v29 }
 0x12b   : > { %v1240_v42 = vmax.f32 %v2944_v12, %v1176_v46  ;;  %v1242_v61 = vmax.f32 %v2946_v38, %v1178_v31  ;;  %v961_v48 = vadd.f32 %v897_v5, %v733_v60  ;;  %v1241_v29 = vmax.f32 %v1113_v47, %v1177_v55 }
 0x12c   : > { %v1179_v45 = vmul.f32 0.2, %v1115_v56  ;;  %v1180_v14 = vmul.f32 0.2, %v1116_v52  ;;  %v1181_v63 = vmul.f32 0.2, %v1117_v20  ;;  %v2998_v12 = vadd.f32 %v1054_v15, %v962_v6 }
 0x12d   : > { %v1182_v51 = vmul.f32 0.2, %v1118_v44  ;;  %v2987_v62 = vpop.permute.xlu1 %409  ;;  %v510_v47 = vmul.f32 %v2485_v28, %v2904_v21  ;;  %v3005_v40 = vadd.f32 %v1054_v15, %v961_v48  ;;  %v517_v5 = vmul.f32 %v2497_v33, %v415_v9 }
 0x12e   : > { %v1244_v17 = vmax.f32 %v1116_v52, %v1180_v14  ;;  %v1243_v0 = vmax.f32 %v1115_v56, %v1179_v45  ;;  %v1245_v13 = vmax.f32 %v1117_v20, %v1181_v63  ;;  %v518_v54 = vmul.f32 %v2485_v28, %v415_v9 }
 0x12f   : > { %v1246_v43 = vmax.f32 %v1118_v44, %v1182_v51  ;;  %v899_v56 = vmul.f32 %v2475_v24, %v2962_v50  ;;  %v900_v21 = vmul.f32 %v2477_v25, %v2962_v50  ;;  %v901_v52 = vmul.f32 %v2479_v2, %v2962_v50 }
 0x130   : > { %v1300_v38 = vpack.c.bf16 %v1244_v17, %v1240_v42  ;;  %v1299_v31 = vpack.c.bf16 %v1243_v0, %v1239_v53  ;;  %v1301_v10 = vpack.c.bf16 %v1245_v13, %v1241_v29  ;;  %v902_v20 = vmul.f32 %v2481_v26, %v2962_v50 }
 0x131   : > { %v1302_v46 = vpack.c.bf16 %v1246_v43, %v1242_v61  ;;  %v735_v44 = vadd.f32 %v2918_v7, %v507_v4  ;;  %v3021_v9 = vmul.f32 0.2, %v2996_v30  ;;  %v3024_v60 = vmul.f32 0.2, %v2998_v12 }
 0x132   : > { %v577_v55 = vpop.permute.xlu1 %576  ;;  %1465 = vmatprep.subr.bf16.mxu0 %v1300_v38  ;;  %v738_v6 = vadd.f32 %v2938_v34, %v510_v47  ;;  %v3029_v45 = vmul.f32 0.2, %v3003_v8  ;;  %v3032_v50 = vmul.f32 0.2, %v3005_v40  ;;  %v743_v7 = vadd.f32 %v2952_v39, %v515_v41 }
 0x133   : > { %1578 = vmatprep.subr.bf16.mxu1 %v1302_v46  ;;  %1466 = vmatpush1.bf16.msra.mxu0 %v1299_v31  ;;  %v745_v14 = vadd.f32 %v2960_v23, %v517_v5  ;;  %v746_v63 = vadd.f32 %v682_v49, %v518_v54  ;;  %v963_v51 = vadd.f32 %v899_v56, %v735_v44  ;;  %v1069_v31 = vpop.permute.xlu0 %1068 }
 0x134   : > { %1579 = vmatpush1.bf16.msra.mxu1 %v1301_v10  ;;  %v964_v42 = vadd.f32 %v900_v21, %v736_v59  ;;  %v965_v61 = vadd.f32 %v901_v52, %v737_v58  ;;  %v966_v3 = vadd.f32 %v902_v20, %v738_v6  ;;  %v675_v34 = vmul.f32 %v2467_v18, %v577_v55 }
 0x135   : > { %v676_v11 = vmul.f32 %v2469_v19, %v577_v55  ;;  %v1248_v48 = vmax.f32 %v2996_v30, %v3021_v9  ;;  %v1250_v39 = vmax.f32 %v2998_v12, %v3024_v60  ;;  %v511_v1 = vmul.f32 %v2495_v32, %v2987_v62  ;;  %v2129_v12 = vld [vmem:[%s3139_s3] sm:$0xff]  }
 0x136   : > { %v512_v23 = vmul.f32 %v2483_v27, %v2987_v62  ;;  %v1247_v49 = vmax.f32 %v3003_v8, %v3029_v45  ;;  %v1249_v18 = vmax.f32 %v3005_v40, %v3032_v50  ;;  %v513_v19 = vmul.f32 %v2497_v33, %v2987_v62 }
 0x137   : > { %v805_v4 = vpop.permute.xlu1 %804  ;;  %v677_v53 = vmul.f32 %v2471_v22, %v577_v55  ;;  %v678_v29 = vmul.f32 %v3165_v16, %v577_v55  ;;  %v514_v13 = vmul.f32 %v2485_v28, %v2987_v62  ;;  %v739_v36 = vadd.f32 %v675_v34, %v511_v1 }
 0x138   : > { %v903_v15 = vmul.f32 %v2475_v24, %v805_v4  ;;  %v740_v33 = vadd.f32 %v676_v11, %v512_v23  ;;  %v904_v22 = vmul.f32 %v2477_v25, %v805_v4  ;;  %v905_v16 = vmul.f32 %v2479_v2, %v805_v4 }
 0x139   : > { %v742_v10 = vadd.f32 %v678_v29, %v514_v13  ;;  %v906_v47 = vmul.f32 %v2481_v26, %v805_v4  ;;  %v3177_v60 = vmov 0  }
 0x13a   : > { %v967_v41 = vadd.f32 %v903_v15, %v739_v36  ;;  %v968_v56 = vadd.f32 %v904_v22, %v740_v33 }
 0x13b   : > { %v809_v17 = vpop.permute.xlu1 %808  ;;  %v970_v58 = vadd.f32 %v906_v47, %v742_v10 }
 0x13c   : > { %v907_v32 = vmul.f32 %v2475_v24, %v809_v17  ;;  %v908_v27 = vmul.f32 %v2477_v25, %v809_v17  ;;  %v909_v43 = vmul.f32 %v2479_v2, %v809_v17  ;;  %v910_v0 = vmul.f32 %v2481_v26, %v809_v17 }
 0x13d   : > { %v741_v24 = vadd.f32 %v677_v53, %v513_v19 }
 0x13e   : > { %v971_v37 = vadd.f32 %v907_v32, %v743_v7  ;;  %v972_v38 = vadd.f32 %v908_v27, %v744_v57  ;;  %v974_v46 = vadd.f32 %v910_v0, %v746_v63  ;;  %v973_v55 = vadd.f32 %v909_v43, %v745_v14 }
 0x13f   : > { %v969_v2 = vadd.f32 %v905_v16, %v741_v24  ;;  %v2133_v16 = vld [vmem:[%s3139_s3 + $0x20] sm:$0xff]  }
 0x140   : > { %v1059_v8 = vpop.permute.xlu1 %1058  ;;  %v1132_v40 = vadd.f32 %v1069_v31, %v972_v38  ;;  %v1134_v35 = vadd.f32 %v1069_v31, %v974_v46  ;;  %v1131_v28 = vadd.f32 %v1069_v31, %v971_v37  ;;  %v1133_v7 = vadd.f32 %v1069_v31, %v973_v55  ;;  %v2134_v37 = vld [vmem:[%s3139_s3 + $0x28] sm:$0xff]   ;;  %v2135_v38 = vld [vmem:[%s3139_s3 + $0x30] sm:$0xff]   ;;  %v2136_v46 = vld [vmem:[%s3139_s3 + $0x38] sm:$0xff]   ;;  %v1335_v31 = vpop.permute.xlu0 %1334 }
 0x141   : > { %v1123_v62 = vadd.f32 %v1059_v8, %v963_v51  ;;  %v1124_v5 = vadd.f32 %v1059_v8, %v964_v42  ;;  %v1125_v54 = vadd.f32 %v1059_v8, %v965_v61  ;;  %v1126_v25 = vadd.f32 %v1059_v8, %v966_v3 }
 0x142   : > { %v1196_v21 = vmul.f32 0.2, %v1132_v40  ;;  %v1195_v52 = vmul.f32 0.2, %v1131_v28  ;;  %v1198_v50 = vmul.f32 0.2, %v1134_v35 }
 0x143   : > { %v1187_v20 = vmul.f32 0.2, %v1123_v62  ;;  %v1188_v44 = vmul.f32 0.2, %v1124_v5  ;;  %v1189_v59 = vmul.f32 0.2, %v1125_v54 }
 0x144   : > { %v1190_v6 = vmul.f32 0.2, %v1126_v25  ;;  %v1064_v26 = vpop.permute.xlu1 %1063  ;;  %v1260_v45 = vmax.f32 %v1132_v40, %v1196_v21  ;;  %v1259_v23 = vmax.f32 %v1131_v28, %v1195_v52  ;;  %v1197_v43 = vmul.f32 0.2, %v1133_v7 }
 0x145   : > { %v1127_v57 = vadd.f32 %v1064_v26, %v967_v41  ;;  %v1128_v14 = vadd.f32 %v1064_v26, %v968_v56  ;;  %v1129_v63 = vadd.f32 %v1064_v26, %v969_v2  ;;  %v1130_v4 = vadd.f32 %v1064_v26, %v970_v58 }
 0x146   : > { %v1252_v51 = vmax.f32 %v1124_v5, %v1188_v44  ;;  %v1254_v42 = vmax.f32 %v1126_v25, %v1190_v6  ;;  %v1251_v61 = vmax.f32 %v1123_v62, %v1187_v20  ;;  %v1253_v3 = vmax.f32 %v1125_v54, %v1189_v59 }
 0x147   : > { %v1191_v34 = vmul.f32 0.2, %v1127_v57  ;;  %v1192_v11 = vmul.f32 0.2, %v1128_v14  ;;  %v1193_v1 = vmul.f32 0.2, %v1129_v63  ;;  %v1262_v13 = vmax.f32 %v1134_v35, %v1198_v50 }
 0x148   : > { %v1194_v19 = vmul.f32 0.2, %v1130_v4  ;;  %v1304_v53 = vpack.c.bf16 %v1252_v51, %v1248_v48  ;;  %v1306_v29 = vpack.c.bf16 %v1254_v42, %v1250_v39  ;;  %v1303_v15 = vpack.c.bf16 %v1251_v61, %v1247_v49  ;;  %v2130_v39 = vld [vmem:[%s3139_s3 + $0x8] sm:$0xff]   ;;  %v2131_v49 = vld [vmem:[%s3139_s3 + $0x10] sm:$0xff]   ;;  %v1330_v24 = vpop.permute.xlu1 %1329 }
 0x149   : > { %v1305_v17 = vpack.c.bf16 %v1253_v3, %v1249_v18  ;;  %v1256_v32 = vmax.f32 %v1128_v14, %v1192_v11  ;;  %v1255_v27 = vmax.f32 %v1127_v57, %v1191_v34  ;;  %v1257_v36 = vmax.f32 %v1129_v63, %v1193_v1  ;;  %v2132_v18 = vld [vmem:[%s3139_s3 + $0x18] sm:$0xff]  }
 0x14a   : > { %1467 = vmatprep.subr.bf16.mxu0 %v1304_v53  ;;  %1580 = vmatprep.subr.bf16.mxu1 %v1306_v29  ;;  %v1258_v0 = vmax.f32 %v1130_v4, %v1194_v19  ;;  %v1261_v30 = vmax.f32 %v1133_v7, %v1197_v43  ;;  %v1345_v7 = vpop.permute.xlu0 %1344 }
 0x14b   : > { %1468 = vmatpush1.bf16.msra.mxu0 %v1303_v15  ;;  %1581 = vmatpush1.bf16.msra.mxu1 %v1305_v17  ;;  %v1308_v33 = vpack.c.bf16 %v1260_v45, %v1256_v32  ;;  %v1307_v22 = vpack.c.bf16 %v1259_v23, %v1255_v27 }
 0x14c   : > { %v1310_v9 = vpack.c.bf16 %v1262_v13, %v1258_v0  ;;  %v1309_v48 = vpack.c.bf16 %v1261_v30, %v1257_v36  ;;  %v1340_v57 = vpop.permute.xlu1 %1339 }
 0x14d   : > { %1469 = vmatprep.subr.bf16.mxu0 %v1308_v33 }
 0x14e   : > { %1582 = vmatprep.subr.bf16.mxu1 %v1310_v9 }
 0x14f   : > { %1470 = vmatpush1.bf16.msra.mxu0 %v1307_v22  ;;  %1583 = vmatpush1.bf16.msra.mxu1 %v1309_v48 }
 0x152   : > { %1488 = vmatmul.mubr.bf16.vlgmr.msra.gmra.mrb[0].mxu0 %v2129_v12  ;;  %1601 = vmatmul.mubr.bf16.vlgmr.msra.gmra.mrb[0].mxu1 %v2129_v12 }
 0x153   : > { %1497 = vmatprep.mubr.bf16.mxu0 %v3177_v60  ;;  %1610 = vmatprep.mubr.bf16.mxu1 %v3177_v60 }
 0x15a   : > { %1498 = vmatmul.mubr.bf16.gmra.mrb[4].mxu0 %v2130_v39  ;;  %1611 = vmatmul.mubr.bf16.gmra.mrb[4].mxu1 %v2130_v39 }
 0x15b   : > { %1507 = vmatprep.mubr.bf16.mxu0 %v3177_v60  ;;  %1620 = vmatprep.mubr.bf16.mxu1 %v3177_v60 }
 0x162   : > { %1508 = vmatmul.mubr.bf16.gmra.mrb[8].mxu0 %v2131_v49  ;;  %1621 = vmatmul.mubr.bf16.gmra.mrb[8].mxu1 %v2131_v49 }
 0x163   : > { %1517 = vmatprep.mubr.bf16.mxu0 %v3177_v60  ;;  %1630 = vmatprep.mubr.bf16.mxu1 %v3177_v60 }
 0x16a   : > { %1518 = vmatmul.mubr.bf16.gmra.mrb[12].mxu0 %v2132_v18  ;;  %1631 = vmatmul.mubr.bf16.gmra.mrb[12].mxu1 %v2132_v18 }
 0x16b   : > { %1527 = vmatprep.mubr.bf16.mxu0 %v3177_v60  ;;  %1640 = vmatprep.mubr.bf16.mxu1 %v3177_v60 }
 0x172   : > { %1528 = vmatmul.mubr.bf16.gmra.mrb[16].mxu0 %v2133_v16  ;;  %1641 = vmatmul.mubr.bf16.gmra.mrb[16].mxu1 %v2133_v16 }
 0x173   : > { %1537 = vmatprep.mubr.bf16.mxu0 %v3177_v60  ;;  %1650 = vmatprep.mubr.bf16.mxu1 %v3177_v60 }
 0x17a   : > { %1538 = vmatmul.mubr.bf16.gmra.mrb[20].mxu0 %v2134_v37  ;;  %1651 = vmatmul.mubr.bf16.gmra.mrb[20].mxu1 %v2134_v37 }
 0x17b   : > { %1547 = vmatprep.mubr.bf16.mxu0 %v3177_v60  ;;  %1660 = vmatprep.mubr.bf16.mxu1 %v3177_v60 }
 0x182   : > { %1548 = vmatmul.mubr.bf16.gmra.mrb[24].mxu0 %v2135_v38  ;;  %1661 = vmatmul.mubr.bf16.gmra.mrb[24].mxu1 %v2135_v38 }
 0x183   : > { %1557 = vmatprep.mubr.bf16.mxu0 %v3177_v60  ;;  %1670 = vmatprep.mubr.bf16.mxu1 %v3177_v60 }
 0x18a   : > { %1558 = vmatmul.mubr.bf16.gmra.mrb[28].mxu0 %v2136_v46  ;;  %1671 = vmatmul.mubr.bf16.gmra.mrb[28].mxu1 %v2136_v46 }
 0x18b   : > { %1880 = vmatprep.mubr.bf16.mxu0 %v3177_v60  ;;  %1921 = vmatprep.mubr.bf16.mxu1 %v3177_v60 }
 0x225   : > { %v1489_v10 = vpop.f32.mrb[0].mxu0  ;;  %v1602_v47 = vpop.f32.mrb[0].mxu1 }
 0x226   : > { %v1490_v41 = vadd.f32 %v1489_v10, %v1330_v24  ;;  %v1603_v55 = vadd.f32 %v1602_v47, %v1330_v24  ;;  %v1491_v8 = vpop.f32.mrb[1].mxu0  ;;  %v1604_v40 = vpop.f32.mrb[1].mxu1 }
 0x227   : > { %v1492_v35 = vadd.f32 %v1491_v8, %v1330_v24  ;;  %v1605_v28 = vadd.f32 %v1604_v40, %v1330_v24  ;;  %v1493_v62 = vpop.f32.mrb[2].mxu0  ;;  %v1606_v5 = vpop.f32.mrb[2].mxu1 }
 0x228   : > { %v1681_v54 = vmul.f32 0.2, %v1490_v41  ;;  %v1683_v25 = vmul.f32 0.2, %v1603_v55  ;;  %v1494_v56 = vadd.f32 %v1493_v62, %v1335_v31  ;;  %v1607_v2 = vadd.f32 %v1606_v5, %v1335_v31  ;;  %v1495_v21 = vpop.f32.mrb[3].mxu0  ;;  %v1608_v52 = vpop.f32.mrb[3].mxu1 }
 0x229   : > { %v1682_v20 = vmul.f32 0.2, %v1492_v35  ;;  %v1684_v44 = vmul.f32 0.2, %v1605_v28  ;;  %v1496_v59 = vadd.f32 %v1495_v21, %v1335_v31  ;;  %v1609_v58 = vadd.f32 %v1608_v52, %v1335_v31  ;;  %v1355_v31 = vpop.permute.xlu0 %1354  ;;  %v1350_v24 = vpop.permute.xlu1 %1349 }
 0x22a   : > { %v1685_v6 = vmul.f32 0.2, %v1494_v56  ;;  %v1687_v26 = vmul.f32 0.2, %v1607_v2  ;;  %v1745_v14 = vmax.f32 %v1490_v41, %v1681_v54  ;;  %v1747_v63 = vmax.f32 %v1603_v55, %v1683_v25 }
 0x22b   : > { %v1686_v45 = vmul.f32 0.2, %v1496_v59  ;;  %v1688_v50 = vmul.f32 0.2, %v1609_v58  ;;  %v1746_v42 = vmax.f32 %v1492_v35, %v1682_v20  ;;  %v1748_v61 = vmax.f32 %v1605_v28, %v1684_v44 }
 0x22c   : > { %v1749_v4 = vmax.f32 %v1494_v56, %v1685_v6  ;;  %v1751_v51 = vmax.f32 %v1607_v2, %v1687_v26 }
 0x22d   : > { %v1750_v3 = vmax.f32 %v1496_v59, %v1686_v45  ;;  %v1752_v34 = vmax.f32 %v1609_v58, %v1688_v50  ;;  %v1499_v11 = vpop.f32.mrb[4].mxu0  ;;  %v1612_v1 = vpop.f32.mrb[4].mxu1 }
 0x22e   : > { %v1810_v23 = vpack.c.bf16 %v1749_v4, %v1745_v14  ;;  %v1812_v19 = vpack.c.bf16 %v1751_v51, %v1747_v63  ;;  %v1500_v53 = vadd.f32 %v1499_v11, %v1340_v57  ;;  %v1613_v29 = vadd.f32 %v1612_v1, %v1340_v57  ;;  %v1501_v15 = vpop.f32.mrb[5].mxu0  ;;  %v1614_v17 = vpop.f32.mrb[5].mxu1 }
 0x22f   : > { %v1502_v32 = vadd.f32 %v1501_v15, %v1340_v57  ;;  %v1615_v27 = vadd.f32 %v1614_v17, %v1340_v57  ;;  %v1503_v43 = vpop.f32.mrb[6].mxu0  ;;  %v1616_v0 = vpop.f32.mrb[6].mxu1  ;;  %v1811_v13 = vpack.c.bf16 %v1750_v3, %v1746_v42  ;;  %v1813_v36 = vpack.c.bf16 %v1752_v34, %v1748_v61 }
 0x230   : > { %v1689_v33 = vmul.f32 0.2, %v1500_v53  ;;  %v1691_v22 = vmul.f32 0.2, %v1613_v29  ;;  %v1504_v30 = vadd.f32 %v1503_v43, %v1345_v7  ;;  %v1617_v9 = vadd.f32 %v1616_v0, %v1345_v7  ;;  %v1505_v48 = vpop.f32.mrb[7].mxu0  ;;  %v1618_v12 = vpop.f32.mrb[7].mxu1 }
 0x231   : > { %v1690_v60 = vmul.f32 0.2, %v1502_v32  ;;  %v1692_v39 = vmul.f32 0.2, %v1615_v27  ;;  %v1506_v49 = vadd.f32 %v1505_v48, %v1345_v7  ;;  %v1619_v18 = vadd.f32 %v1618_v12, %v1345_v7  ;;  %1848 = vmatprep.subr.bf16.mxu0 %v1811_v13  ;;  %1889 = vmatprep.subr.bf16.mxu1 %v1813_v36 }
 0x232   : > { %v1693_v16 = vmul.f32 0.2, %v1504_v30  ;;  %v1695_v37 = vmul.f32 0.2, %v1617_v9  ;;  %1849 = vmatpush1.bf16.msra.mxu0 %v1810_v23  ;;  %1890 = vmatpush1.bf16.msra.mxu1 %v1812_v19  ;;  %v1753_v10 = vmax.f32 %v1500_v53, %v1689_v33  ;;  %v1755_v47 = vmax.f32 %v1613_v29, %v1691_v22  ;;  %v1365_v23 = vpop.permute.xlu0 %1364  ;;  %v1360_v19 = vpop.permute.xlu1 %1359 }
 0x233   : > { %v1694_v38 = vmul.f32 0.2, %v1506_v49  ;;  %v1696_v46 = vmul.f32 0.2, %v1619_v18  ;;  %v1754_v8 = vmax.f32 %v1502_v32, %v1690_v60  ;;  %v1756_v40 = vmax.f32 %v1615_v27, %v1692_v39 }
 0x234   : > { %v1757_v41 = vmax.f32 %v1504_v30, %v1693_v16  ;;  %v1759_v55 = vmax.f32 %v1617_v9, %v1695_v37 }
 0x235   : > { %v1758_v35 = vmax.f32 %v1506_v49, %v1694_v38  ;;  %v1760_v28 = vmax.f32 %v1619_v18, %v1696_v46  ;;  %v1509_v62 = vpop.f32.mrb[8].mxu0  ;;  %v1622_v5 = vpop.f32.mrb[8].mxu1 }
 0x236   : > { %v1814_v54 = vpack.c.bf16 %v1757_v41, %v1753_v10  ;;  %v1816_v25 = vpack.c.bf16 %v1759_v55, %v1755_v47  ;;  %v1510_v56 = vadd.f32 %v1509_v62, %v1350_v24  ;;  %v1623_v2 = vadd.f32 %v1622_v5, %v1350_v24  ;;  %v1511_v21 = vpop.f32.mrb[9].mxu0  ;;  %v1624_v52 = vpop.f32.mrb[9].mxu1 }
 0x237   : > { %v1512_v20 = vadd.f32 %v1511_v21, %v1350_v24  ;;  %v1625_v44 = vadd.f32 %v1624_v52, %v1350_v24  ;;  %v1513_v59 = vpop.f32.mrb[10].mxu0  ;;  %v1626_v58 = vpop.f32.mrb[10].mxu1  ;;  %v1815_v6 = vpack.c.bf16 %v1758_v35, %v1754_v8  ;;  %v1817_v26 = vpack.c.bf16 %v1760_v28, %v1756_v40 }
 0x238   : > { %v1697_v45 = vmul.f32 0.2, %v1510_v56  ;;  %v1699_v50 = vmul.f32 0.2, %v1623_v2  ;;  %v1514_v7 = vadd.f32 %v1513_v59, %v1355_v31  ;;  %v1627_v57 = vadd.f32 %v1626_v58, %v1355_v31  ;;  %v1515_v14 = vpop.f32.mrb[11].mxu0  ;;  %v1628_v63 = vpop.f32.mrb[11].mxu1 }
 0x239   : > { %v1698_v4 = vmul.f32 0.2, %v1512_v20  ;;  %v1700_v51 = vmul.f32 0.2, %v1625_v44  ;;  %v1516_v42 = vadd.f32 %v1515_v14, %v1355_v31  ;;  %v1629_v61 = vadd.f32 %v1628_v63, %v1355_v31  ;;  %1850 = vmatprep.subr.bf16.mxu0 %v1815_v6  ;;  %1891 = vmatprep.subr.bf16.mxu1 %v1817_v26 }
 0x23a   : > { %v1701_v3 = vmul.f32 0.2, %v1514_v7  ;;  %v1703_v34 = vmul.f32 0.2, %v1627_v57  ;;  %1851 = vmatpush1.bf16.msra.mxu0 %v1814_v54  ;;  %1892 = vmatpush1.bf16.msra.mxu1 %v1816_v25  ;;  %v1761_v53 = vmax.f32 %v1510_v56, %v1697_v45  ;;  %v1763_v29 = vmax.f32 %v1623_v2, %v1699_v50  ;;  %v1375_v54 = vpop.permute.xlu0 %1374  ;;  %v1370_v25 = vpop.permute.xlu1 %1369 }
 0x23b   : > { %v1702_v11 = vmul.f32 0.2, %v1516_v42  ;;  %v1704_v1 = vmul.f32 0.2, %v1629_v61  ;;  %v1762_v32 = vmax.f32 %v1512_v20, %v1698_v4  ;;  %v1764_v27 = vmax.f32 %v1625_v44, %v1700_v51 }
 0x23c   : > { %v1765_v15 = vmax.f32 %v1514_v7, %v1701_v3  ;;  %v1767_v17 = vmax.f32 %v1627_v57, %v1703_v34 }
 0x23d   : > { %v1766_v43 = vmax.f32 %v1516_v42, %v1702_v11  ;;  %v1768_v0 = vmax.f32 %v1629_v61, %v1704_v1  ;;  %v1519_v13 = vpop.f32.mrb[12].mxu0  ;;  %v1632_v36 = vpop.f32.mrb[12].mxu1 }
 0x23e   : > { %v1818_v33 = vpack.c.bf16 %v1765_v15, %v1761_v53  ;;  %v1820_v22 = vpack.c.bf16 %v1767_v17, %v1763_v29  ;;  %v1520_v30 = vadd.f32 %v1519_v13, %v1360_v19  ;;  %v1633_v9 = vadd.f32 %v1632_v36, %v1360_v19  ;;  %v1521_v48 = vpop.f32.mrb[13].mxu0  ;;  %v1634_v12 = vpop.f32.mrb[13].mxu1 }
 0x23f   : > { %v1522_v60 = vadd.f32 %v1521_v48, %v1360_v19  ;;  %v1635_v39 = vadd.f32 %v1634_v12, %v1360_v19  ;;  %v1523_v49 = vpop.f32.mrb[14].mxu0  ;;  %v1636_v18 = vpop.f32.mrb[14].mxu1  ;;  %v1819_v16 = vpack.c.bf16 %v1766_v43, %v1762_v32  ;;  %v1821_v37 = vpack.c.bf16 %v1768_v0, %v1764_v27 }
 0x240   : > { %v1705_v38 = vmul.f32 0.2, %v1520_v30  ;;  %v1707_v46 = vmul.f32 0.2, %v1633_v9  ;;  %v1524_v31 = vadd.f32 %v1523_v49, %v1365_v23  ;;  %v1637_v24 = vadd.f32 %v1636_v18, %v1365_v23  ;;  %v1525_v10 = vpop.f32.mrb[15].mxu0  ;;  %v1638_v47 = vpop.f32.mrb[15].mxu1 }
 0x241   : > { %v1706_v41 = vmul.f32 0.2, %v1522_v60  ;;  %v1708_v55 = vmul.f32 0.2, %v1635_v39  ;;  %v1526_v8 = vadd.f32 %v1525_v10, %v1365_v23  ;;  %v1639_v40 = vadd.f32 %v1638_v47, %v1365_v23  ;;  %1852 = vmatprep.subr.bf16.mxu0 %v1819_v16  ;;  %1893 = vmatprep.subr.bf16.mxu1 %v1821_v37 }
 0x242   : > { %v1709_v35 = vmul.f32 0.2, %v1524_v31  ;;  %v1711_v28 = vmul.f32 0.2, %v1637_v24  ;;  %1853 = vmatpush1.bf16.msra.mxu0 %v1818_v33  ;;  %1894 = vmatpush1.bf16.msra.mxu1 %v1820_v22  ;;  %v1769_v56 = vmax.f32 %v1520_v30, %v1705_v38  ;;  %v1771_v2 = vmax.f32 %v1633_v9, %v1707_v46  ;;  %v1385_v33 = vpop.permute.xlu0 %1384  ;;  %v1380_v22 = vpop.permute.xlu1 %1379 }
 0x243   : > { %v1710_v62 = vmul.f32 0.2, %v1526_v8  ;;  %v1712_v5 = vmul.f32 0.2, %v1639_v40  ;;  %v1770_v20 = vmax.f32 %v1522_v60, %v1706_v41  ;;  %v1772_v44 = vmax.f32 %v1635_v39, %v1708_v55 }
 0x244   : > { %v1773_v21 = vmax.f32 %v1524_v31, %v1709_v35  ;;  %v1775_v52 = vmax.f32 %v1637_v24, %v1711_v28 }
 0x245   : > { %v1774_v59 = vmax.f32 %v1526_v8, %v1710_v62  ;;  %v1776_v58 = vmax.f32 %v1639_v40, %v1712_v5  ;;  %v1529_v6 = vpop.f32.mrb[16].mxu0  ;;  %v1642_v26 = vpop.f32.mrb[16].mxu1 }
 0x246   : > { %v1822_v45 = vpack.c.bf16 %v1773_v21, %v1769_v56  ;;  %v1824_v50 = vpack.c.bf16 %v1775_v52, %v1771_v2  ;;  %v1530_v7 = vadd.f32 %v1529_v6, %v1370_v25  ;;  %v1643_v57 = vadd.f32 %v1642_v26, %v1370_v25  ;;  %v1531_v14 = vpop.f32.mrb[17].mxu0  ;;  %v1644_v63 = vpop.f32.mrb[17].mxu1 }
 0x247   : > { %v1532_v4 = vadd.f32 %v1531_v14, %v1370_v25  ;;  %v1645_v51 = vadd.f32 %v1644_v63, %v1370_v25  ;;  %v1533_v42 = vpop.f32.mrb[18].mxu0  ;;  %v1646_v61 = vpop.f32.mrb[18].mxu1  ;;  %v1823_v3 = vpack.c.bf16 %v1774_v59, %v1770_v20  ;;  %v1825_v34 = vpack.c.bf16 %v1776_v58, %v1772_v44 }
 0x248   : > { %v1713_v11 = vmul.f32 0.2, %v1530_v7  ;;  %v1715_v1 = vmul.f32 0.2, %v1643_v57  ;;  %v1534_v23 = vadd.f32 %v1533_v42, %v1375_v54  ;;  %v1647_v19 = vadd.f32 %v1646_v61, %v1375_v54  ;;  %v1535_v53 = vpop.f32.mrb[19].mxu0  ;;  %v1648_v29 = vpop.f32.mrb[19].mxu1 }
 0x249   : > { %v1714_v15 = vmul.f32 0.2, %v1532_v4  ;;  %v1716_v17 = vmul.f32 0.2, %v1645_v51  ;;  %v1536_v32 = vadd.f32 %v1535_v53, %v1375_v54  ;;  %v1649_v27 = vadd.f32 %v1648_v29, %v1375_v54  ;;  %1854 = vmatprep.subr.bf16.mxu0 %v1823_v3  ;;  %1895 = vmatprep.subr.bf16.mxu1 %v1825_v34 }
 0x24a   : > { %v1717_v43 = vmul.f32 0.2, %v1534_v23  ;;  %v1719_v0 = vmul.f32 0.2, %v1647_v19  ;;  %1855 = vmatpush1.bf16.msra.mxu0 %v1822_v45  ;;  %1896 = vmatpush1.bf16.msra.mxu1 %v1824_v50  ;;  %v1777_v30 = vmax.f32 %v1530_v7, %v1713_v11  ;;  %v1779_v9 = vmax.f32 %v1643_v57, %v1715_v1  ;;  %v1395_v45 = vpop.permute.xlu0 %1394  ;;  %v1390_v50 = vpop.permute.xlu1 %1389 }
 0x24b   : > { %v1718_v13 = vmul.f32 0.2, %v1536_v32  ;;  %v1720_v36 = vmul.f32 0.2, %v1649_v27  ;;  %v1778_v60 = vmax.f32 %v1532_v4, %v1714_v15  ;;  %v1780_v39 = vmax.f32 %v1645_v51, %v1716_v17 }
 0x24c   : > { %v1781_v48 = vmax.f32 %v1534_v23, %v1717_v43  ;;  %v1783_v12 = vmax.f32 %v1647_v19, %v1719_v0 }
 0x24d   : > { %v1782_v49 = vmax.f32 %v1536_v32, %v1718_v13  ;;  %v1784_v18 = vmax.f32 %v1649_v27, %v1720_v36  ;;  %v1539_v16 = vpop.f32.mrb[20].mxu0  ;;  %v1652_v37 = vpop.f32.mrb[20].mxu1 }
 0x24e   : > { %v1826_v38 = vpack.c.bf16 %v1781_v48, %v1777_v30  ;;  %v1828_v46 = vpack.c.bf16 %v1783_v12, %v1779_v9  ;;  %v1540_v31 = vadd.f32 %v1539_v16, %v1380_v22  ;;  %v1653_v24 = vadd.f32 %v1652_v37, %v1380_v22  ;;  %v1541_v10 = vpop.f32.mrb[21].mxu0  ;;  %v1654_v47 = vpop.f32.mrb[21].mxu1 }
 0x24f   : > { %v1542_v41 = vadd.f32 %v1541_v10, %v1380_v22  ;;  %v1655_v55 = vadd.f32 %v1654_v47, %v1380_v22  ;;  %v1543_v8 = vpop.f32.mrb[22].mxu0  ;;  %v1656_v40 = vpop.f32.mrb[22].mxu1  ;;  %v1827_v35 = vpack.c.bf16 %v1782_v49, %v1778_v60  ;;  %v1829_v28 = vpack.c.bf16 %v1784_v18, %v1780_v39 }
 0x250   : > { %v1721_v62 = vmul.f32 0.2, %v1540_v31  ;;  %v1723_v5 = vmul.f32 0.2, %v1653_v24  ;;  %v1544_v54 = vadd.f32 %v1543_v8, %v1385_v33  ;;  %v1657_v25 = vadd.f32 %v1656_v40, %v1385_v33  ;;  %v1545_v56 = vpop.f32.mrb[23].mxu0  ;;  %v1658_v2 = vpop.f32.mrb[23].mxu1 }
 0x251   : > { %v1722_v21 = vmul.f32 0.2, %v1542_v41  ;;  %v1724_v52 = vmul.f32 0.2, %v1655_v55  ;;  %v1546_v20 = vadd.f32 %v1545_v56, %v1385_v33  ;;  %v1659_v44 = vadd.f32 %v1658_v2, %v1385_v33  ;;  %1856 = vmatprep.subr.bf16.mxu0 %v1827_v35  ;;  %1897 = vmatprep.subr.bf16.mxu1 %v1829_v28 }
 0x252   : > { %v1725_v59 = vmul.f32 0.2, %v1544_v54  ;;  %v1727_v58 = vmul.f32 0.2, %v1657_v25  ;;  %1857 = vmatpush1.bf16.msra.mxu0 %v1826_v38  ;;  %1898 = vmatpush1.bf16.msra.mxu1 %v1828_v46  ;;  %v1785_v7 = vmax.f32 %v1540_v31, %v1721_v62  ;;  %v1787_v57 = vmax.f32 %v1653_v24, %v1723_v5  ;;  %v1405_v38 = vpop.permute.xlu0 %1404  ;;  %v1400_v46 = vpop.permute.xlu1 %1399 }
 0x253   : > { %v1726_v6 = vmul.f32 0.2, %v1546_v20  ;;  %v1728_v26 = vmul.f32 0.2, %v1659_v44  ;;  %v1786_v4 = vmax.f32 %v1542_v41, %v1722_v21  ;;  %v1788_v51 = vmax.f32 %v1655_v55, %v1724_v52 }
 0x254   : > { %v1789_v14 = vmax.f32 %v1544_v54, %v1725_v59  ;;  %v1791_v63 = vmax.f32 %v1657_v25, %v1727_v58 }
 0x255   : > { %v1790_v42 = vmax.f32 %v1546_v20, %v1726_v6  ;;  %v1792_v61 = vmax.f32 %v1659_v44, %v1728_v26  ;;  %v1549_v3 = vpop.f32.mrb[24].mxu0  ;;  %v1662_v34 = vpop.f32.mrb[24].mxu1 }
 0x256   : > { %v1830_v11 = vpack.c.bf16 %v1789_v14, %v1785_v7  ;;  %v1832_v1 = vpack.c.bf16 %v1791_v63, %v1787_v57  ;;  %v1550_v23 = vadd.f32 %v1549_v3, %v1390_v50  ;;  %v1663_v19 = vadd.f32 %v1662_v34, %v1390_v50  ;;  %v1551_v53 = vpop.f32.mrb[25].mxu0  ;;  %v1664_v29 = vpop.f32.mrb[25].mxu1 }
 0x257   : > { %v1552_v15 = vadd.f32 %v1551_v53, %v1390_v50  ;;  %v1665_v17 = vadd.f32 %v1664_v29, %v1390_v50  ;;  %v1553_v32 = vpop.f32.mrb[26].mxu0  ;;  %v1666_v27 = vpop.f32.mrb[26].mxu1  ;;  %v1831_v43 = vpack.c.bf16 %v1790_v42, %v1786_v4  ;;  %v1833_v0 = vpack.c.bf16 %v1792_v61, %v1788_v51 }
 0x258   : > { %v1729_v13 = vmul.f32 0.2, %v1550_v23  ;;  %v1731_v36 = vmul.f32 0.2, %v1663_v19  ;;  %v1554_v33 = vadd.f32 %v1553_v32, %v1395_v45  ;;  %v1667_v22 = vadd.f32 %v1666_v27, %v1395_v45  ;;  %v1555_v30 = vpop.f32.mrb[27].mxu0  ;;  %v1668_v9 = vpop.f32.mrb[27].mxu1 }
 0x259   : > { %v1730_v48 = vmul.f32 0.2, %v1552_v15  ;;  %v1732_v12 = vmul.f32 0.2, %v1665_v17  ;;  %v1556_v60 = vadd.f32 %v1555_v30, %v1395_v45  ;;  %v1669_v39 = vadd.f32 %v1668_v9, %v1395_v45  ;;  %1858 = vmatprep.subr.bf16.mxu0 %v1831_v43  ;;  %1899 = vmatprep.subr.bf16.mxu1 %v1833_v0  ;;  %v2139_v30 = vld [vmem:[%s2448_s22] sm:$0x77] }
 0x25a   : > { %v1733_v49 = vmul.f32 0.2, %v1554_v33  ;;  %v1735_v18 = vmul.f32 0.2, %v1667_v22  ;;  %1859 = vmatpush1.bf16.msra.mxu0 %v1830_v11  ;;  %1900 = vmatpush1.bf16.msra.mxu1 %v1832_v1  ;;  %v1793_v31 = vmax.f32 %v1550_v23, %v1729_v13  ;;  %v1795_v24 = vmax.f32 %v1663_v19, %v1731_v36  ;;  %v1809_v13 = vld [vmem:[%s3141_s5] sm:$0x3]  ;;  %v1846_v36 = vpop.permute.xlu1 %1845 }
 0x25b   : > { %v1734_v16 = vmul.f32 0.2, %v1556_v60  ;;  %v1736_v37 = vmul.f32 0.2, %v1669_v39  ;;  %v1794_v41 = vmax.f32 %v1552_v15, %v1730_v48  ;;  %v1796_v55 = vmax.f32 %v1665_v17, %v1732_v12  ;;  %v2140_v48 = vld [vmem:[%s2448_s22 + $0x8] sm:$0x77]  ;;  %s316_s22 = scalar_lea.vmem %s3143_s7, %s2045_s18 }
 0x25c   : > { %v1797_v10 = vmax.f32 %v1554_v33, %v1733_v49  ;;  %v1799_v47 = vmax.f32 %v1667_v22, %v1735_v18  ;;  %v1930_v9 = vcombine.high %v2139_v30, %v2139_v30  ;;  %v1931_v12 = vcombine.high %v2140_v48, %v2140_v48 }
 0x25d   : > { %v1798_v8 = vmax.f32 %v1556_v60, %v1734_v16  ;;  %v1800_v40 = vmax.f32 %v1669_v39, %v1736_v37  ;;  %v1559_v35 = vpop.f32.mrb[28].mxu0  ;;  %v1672_v28 = vpop.f32.mrb[28].mxu1 }
 0x25e   : > { %v1834_v62 = vpack.c.bf16 %v1797_v10, %v1793_v31  ;;  %v1836_v5 = vpack.c.bf16 %v1799_v47, %v1795_v24  ;;  %v1560_v54 = vadd.f32 %v1559_v35, %v1400_v46  ;;  %v1673_v25 = vadd.f32 %v1672_v28, %v1400_v46  ;;  %v1561_v56 = vpop.f32.mrb[29].mxu0  ;;  %v1674_v2 = vpop.f32.mrb[29].mxu1 }
 0x25f   : > { %v1562_v21 = vadd.f32 %v1561_v56, %v1400_v46  ;;  %v1675_v52 = vadd.f32 %v1674_v2, %v1400_v46  ;;  %v1563_v20 = vpop.f32.mrb[30].mxu0  ;;  %v1676_v44 = vpop.f32.mrb[30].mxu1  ;;  %v1835_v59 = vpack.c.bf16 %v1798_v8, %v1794_v41  ;;  %v1837_v58 = vpack.c.bf16 %v1800_v40, %v1796_v55 }
 0x260   : > { %v1737_v6 = vmul.f32 0.2, %v1560_v54  ;;  %v1739_v26 = vmul.f32 0.2, %v1673_v25  ;;  %v1564_v45 = vadd.f32 %v1563_v20, %v1405_v38  ;;  %v1677_v50 = vadd.f32 %v1676_v44, %v1405_v38  ;;  %v1565_v7 = vpop.f32.mrb[31].mxu0  ;;  %v1678_v57 = vpop.f32.mrb[31].mxu1 }
 0x261   : > { %v1738_v14 = vmul.f32 0.2, %v1562_v21  ;;  %v1740_v63 = vmul.f32 0.2, %v1675_v52  ;;  %v1566_v4 = vadd.f32 %v1565_v7, %v1405_v38  ;;  %v1679_v51 = vadd.f32 %v1678_v57, %v1405_v38  ;;  %1860 = vmatprep.subr.bf16.mxu0 %v1835_v59  ;;  %1901 = vmatprep.subr.bf16.mxu1 %v1837_v58 }
 0x262   : > { %v1741_v42 = vmul.f32 0.2, %v1564_v45  ;;  %v1743_v61 = vmul.f32 0.2, %v1677_v50  ;;  %1861 = vmatpush1.bf16.msra.mxu0 %v1834_v62  ;;  %1902 = vmatpush1.bf16.msra.mxu1 %v1836_v5  ;;  %v1801_v11 = vmax.f32 %v1560_v54, %v1737_v6  ;;  %v1803_v1 = vmax.f32 %v1673_v25, %v1739_v26 }
 0x263   : > { %v1742_v3 = vmul.f32 0.2, %v1566_v4  ;;  %v1744_v34 = vmul.f32 0.2, %v1679_v51  ;;  %v1802_v53 = vmax.f32 %v1562_v21, %v1738_v14  ;;  %v1804_v29 = vmax.f32 %v1675_v52, %v1740_v63 }
 0x264   : > { %v1805_v23 = vmax.f32 %v1564_v45, %v1741_v42  ;;  %v1807_v19 = vmax.f32 %v1677_v50, %v1743_v61 }
 0x265   : > { %v1806_v15 = vmax.f32 %v1566_v4, %v1742_v3  ;;  %v1808_v17 = vmax.f32 %v1679_v51, %v1744_v34 }
 0x266   : > { %v1838_v32 = vpack.c.bf16 %v1805_v23, %v1801_v11  ;;  %v1840_v27 = vpack.c.bf16 %v1807_v19, %v1803_v1 }
 0x267   : > { %v1839_v43 = vpack.c.bf16 %v1806_v15, %v1802_v53  ;;  %v1841_v0 = vpack.c.bf16 %v1808_v17, %v1804_v29 }
 0x269   : > { %1862 = vmatprep.subr.bf16.mxu0 %v1839_v43  ;;  %1903 = vmatprep.subr.bf16.mxu1 %v1841_v0 }
 0x26a   : > { %1863 = vmatpush1.bf16.msra.mxu0 %v1838_v32  ;;  %1904 = vmatpush1.bf16.msra.mxu1 %v1840_v27 }
 0x26d   : > { %1881 = vmatmul.mubr.bf16.vlgmr.msra.gmra.mrb[32].mxu0 %v1809_v13  ;;  %1922 = vmatmul.mubr.bf16.vlgmr.msra.gmra.mrb[32].mxu1 %v1809_v13 }
 0x340   : > { %v1882_v33 = vpop.f32.mrb[32].mxu0  ;;  %v1923_v22 = vpop.f32.mrb[32].mxu1 }
 0x341   : > { %v1883_v60 = vadd.f32 %v1882_v33, %v1846_v36  ;;  %v1924_v39 = vadd.f32 %v1923_v22, %v1846_v36  ;;  %v1884_v49 = vpop.f32.mrb[33].mxu0  ;;  %v1925_v18 = vpop.f32.mrb[33].mxu1 }
 0x342   : > { %v1885_v16 = vadd.f32 %v1884_v49, %v1846_v36  ;;  %v1926_v37 = vadd.f32 %v1925_v18, %v1846_v36  ;;  %v1886_v38 = vpop.f32.mrb[34].mxu0  ;;  %v1927_v46 = vpop.f32.mrb[34].mxu1 }
 0x343   : > { %v1934_v31 = vadd.f32 %v2139_v30, %v1883_v60  ;;  %v1936_v24 = vadd.f32 %v2140_v48, %v1924_v39  ;;  %v1887_v10 = vpop.f32.mrb[35].mxu0  ;;  %v1928_v47 = vpop.f32.mrb[35].mxu1 }
 0x344   : > { %v1935_v41 = vadd.f32 %v1930_v9, %v1885_v16  ;;  %v1937_v55 = vadd.f32 %v1931_v12, %v1926_v37 }
 0x346   : > { %v1942_v8 = vcombine.low %v1934_v31, %v1935_v41  ;;  %v1943_v40 = vcombine.low %v1936_v24, %v1937_v55 }
 0x348   : > { %1946 = vst [vmem:[%s316_s22] sm:$0x77] %v1942_v8  ;;  %1947 = vst [vmem:[%s316_s22 + $0x8] sm:$0x77] %v1943_v40 }
 0x349 PF: > { %s17_s28 = sadd.s32 1, %s2179_s28   ;;  %s3178_s24 = smov %s2171_s26 }
 0x34a   : > { %p14_p7 = scmp.ge.s32.totalorder %s17_s28, 6   ;;  %s3179_s25 = smov %s2175_s27 }
 0x34b   : > { %s3180_s26 = smov %s3183_s29  ;;  %s3181_s27 = smov %s3187_s30 }
 0x34c   :  { %16 = sbr.rel (!%p14_p7) target bundleno = 3 (0x3), region = 78 }

</bundles_post_ra>
